<compile_context>
chip_gen: v7x
topology: tpu7x:2x2x1
jax: 0.10.0
libtpu: 0.0.40
codegen_flags: <defaults>
</compile_context>

<pallas_src>
import jax
import jax.numpy as jnp
from jax.experimental import pallas as pl
from jax.experimental.pallas import tpu as pltpu

LN_EPS = 1e-5
MASK_BIAS = -1e9   # additive mask bias; exp() underflows to exactly 0 in fp32


def _layernorm(x, gamma, beta):
    mu = jnp.mean(x, axis=-1, keepdims=True)
    var = jnp.mean((x - mu) ** 2, axis=-1, keepdims=True)
    return (x - mu) * jax.lax.rsqrt(var + LN_EPS) * gamma + beta


def transformer_block_kernel(
        kh_ref, vh_ref, qh_ref, qres_ref, bias_ref,
        wq_ref, wk_ref, wv_ref, wo_ref, bo_ref, g1_ref, be1_ref,
        w1_ref, b1_ref, w2_ref, b2_ref, g2_ref, be2_ref,
        out_ref):
    cdt = kh_ref.dtype                           # compute dtype (bf16)
    kh = kh_ref[0]                               # (H, Sk, D) bf16, head-major
    vh = vh_ref[0]                               # (H, Sk, D)
    qh = qh_ref[0]                               # (H, TQ, D)
    bias = bias_ref[0].astype(jnp.float32)       # (TQ, Sk) additive mask bias

    # Shared per-head Q/K/V projections as head-batched matmuls
    # (softmax scale 1/sqrt(embed_size) is pre-folded into wq in the wrapper).
    qp = jnp.einsum("hqd,hde->hqe", qh, wq_ref[...],
                    preferred_element_type=jnp.float32).astype(cdt)
    kp = jnp.einsum("hkd,hde->hke", kh, wk_ref[...],
                    preferred_element_type=jnp.float32).astype(cdt)
    vp = jnp.einsum("hkd,hde->hke", vh, wv_ref[...],
                    preferred_element_type=jnp.float32).astype(cdt)

    # Head-batched attention, fp32 scores / softmax statistics.
    s = jnp.einsum("hqd,hkd->hqk", qp, kp,
                   preferred_element_type=jnp.float32)        # (H, TQ, Sk)
    s = s + bias                                              # broadcast over heads
    m = jnp.max(s, axis=-1, keepdims=True)
    e = jnp.exp(s - m)
    p = e * pl.reciprocal(jnp.sum(e, axis=-1, keepdims=True), approx=True)
    ctx = jnp.einsum("hqk,hkd->hqd", p.astype(cdt), vp,
                     preferred_element_type=jnp.float32)      # (H, TQ, D)

    # Output projection; head-concat is implicit in the h-contraction with
    # wo3 = Wo.T reshaped to (H, D, E).
    attn_out = jnp.sum(
        jnp.einsum("hqd,hde->hqe", ctx.astype(cdt), wo_ref[...],
                   preferred_element_type=jnp.float32),
        axis=0) + bo_ref[...]                                 # (TQ, E) fp32

    # Residual + LayerNorm 1 (dropout == identity at inference).
    x = _layernorm(attn_out + qres_ref[0].astype(jnp.float32),
                   g1_ref[...], be1_ref[...])

    # Feed-forward: Linear -> ReLU -> Linear (bf16 operands, fp32 accumulate).
    h1 = jnp.dot(x.astype(cdt), w1_ref[...],
                 preferred_element_type=jnp.float32) + b1_ref[...]
    h1 = jnp.maximum(h1, 0.0)
    ff = jnp.dot(h1.astype(cdt), w2_ref[...],
                 preferred_element_type=jnp.float32) + b2_ref[...]

    # Residual + LayerNorm 2.
    out = _layernorm(ff + x, g2_ref[...], be2_ref[...])
    out_ref[0] = out.astype(out_ref.dtype)


def init_params(key, embed_size, heads, forward_expansion):
    D = embed_size // heads
    Hff = forward_expansion * embed_size
    ks = jax.random.split(key, 12)

    def lin(k, fan_in, shape):
        bound = 1.0 / (fan_in ** 0.5)
        return jax.random.uniform(k, shape, jnp.float32, -bound, bound)

    return dict(
        Wq=lin(ks[0], D, (D, D)), Wk=lin(ks[1], D, (D, D)), Wv=lin(ks[2], D, (D, D)),
        Wo=lin(ks[3], embed_size, (embed_size, embed_size)),
        bo=lin(ks[4], embed_size, (embed_size,)),
        g1=jnp.ones((embed_size,), jnp.float32), be1=jnp.zeros((embed_size,), jnp.float32),
        W1=lin(ks[5], embed_size, (Hff, embed_size)), b1=lin(ks[6], embed_size, (Hff,)),
        W2=lin(ks[7], Hff, (embed_size, Hff)), b2=lin(ks[8], Hff, (embed_size,)),
        g2=jnp.ones((embed_size,), jnp.float32), be2=jnp.zeros((embed_size,), jnp.float32),
    )


def _prepare_weights(params, heads, compute_dtype):
    """Cast/transpose/reshape weights once in the wrapper (layout plumbing)."""
    E = params["Wo"].shape[0]
    D = E // heads
    Hff = params["W1"].shape[0]
    scale = 1.0 / (E ** 0.5)          # module uses 1/sqrt(embed_size)
    cdt = compute_dtype
    wq_t = (params["Wq"].T * scale).astype(cdt)         # (D, D) scale folded in
    wk_t = params["Wk"].T.astype(cdt)
    wv_t = params["Wv"].T.astype(cdt)
    return dict(
        wq_t=wq_t, wk_t=wk_t, wv_t=wv_t,
        wq_h=jnp.tile(wq_t[None], (heads, 1, 1)),        # (H, D, D) for batched dot
        wk_h=jnp.tile(wk_t[None], (heads, 1, 1)),
        wv_h=jnp.tile(wv_t[None], (heads, 1, 1)),
        wo_t=params["Wo"].T.astype(cdt),                 # (E, E)   (reference only)
        wo3=params["Wo"].T.reshape(heads, D, E).astype(cdt),   # (H, D, E)
        w1_t=params["W1"].T.astype(cdt),                 # (E, Hff)
        w2_t=params["W2"].T.astype(cdt),                 # (Hff, E)
        bo=params["bo"].reshape(1, E).astype(jnp.float32),
        b1=params["b1"].reshape(1, Hff).astype(jnp.float32),
        b2=params["b2"].reshape(1, E).astype(jnp.float32),
        g1=params["g1"].reshape(1, E).astype(jnp.float32),
        be1=params["be1"].reshape(1, E).astype(jnp.float32),
        g2=params["g2"].reshape(1, E).astype(jnp.float32),
        be2=params["be2"].reshape(1, E).astype(jnp.float32),
    )


def _nbytes(shape, dt):
    n = 1
    for d in shape:
        n *= int(d)
    return n * jnp.dtype(dt).itemsize


def transformer_block(keys_t, values_t, queries_t, mask, params, heads,
                      compute_dtype=jnp.bfloat16, tq=None):
    N, Sq, E = queries_t.shape
    Sk = keys_t.shape[1]
    D = E // heads
    cdt = compute_dtype
    prep = _prepare_weights(params, heads, cdt)
    Hff = prep["w1_t"].shape[1]

    if tq is None:
        tq = Sq if Sq <= 256 else 256
    assert Sq % tq == 0 and (tq == Sq or tq % 8 == 0)
    nq = Sq // tq

    # Head-major bf16 Q/K/V so the kernel never re-packs the lane dimension;
    # queries also kept (N, Sq, E) bf16 for the residual; mask shipped as a
    # bf16 additive bias.
    k_hm = keys_t.reshape(N, Sk, heads, D).transpose(0, 2, 1, 3).astype(cdt)
    v_hm = values_t.reshape(N, Sk, heads, D).transpose(0, 2, 1, 3).astype(cdt)
    q_hm = queries_t.reshape(N, Sq, heads, D).transpose(0, 2, 1, 3).astype(cdt)
    q_res = queries_t.astype(cdt)
    bias = jnp.where(mask == 0, MASK_BIAS, 0.0).astype(cdt)

    def w_spec(shp):
        return pl.BlockSpec(shp, lambda b, qi: (0,) * len(shp))

    in_specs = [
        pl.BlockSpec((1, heads, Sk, D), lambda b, qi: (b, 0, 0, 0)),   # K (resident/batch)
        pl.BlockSpec((1, heads, Sk, D), lambda b, qi: (b, 0, 0, 0)),   # V
        pl.BlockSpec((1, heads, tq, D), lambda b, qi: (b, 0, qi, 0)),  # Q tile
        pl.BlockSpec((1, tq, E), lambda b, qi: (b, qi, 0)),            # Q residual tile
        pl.BlockSpec((1, tq, Sk), lambda b, qi: (b, qi, 0)),           # mask bias tile
        w_spec((heads, D, D)), w_spec((heads, D, D)), w_spec((heads, D, D)),
        w_spec((heads, D, E)), w_spec((1, E)),
        w_spec((1, E)), w_spec((1, E)),
        w_spec((E, Hff)), w_spec((1, Hff)),
        w_spec((Hff, E)), w_spec((1, E)),
        w_spec((1, E)), w_spec((1, E)),
    ]

    operands = (k_hm, v_hm, q_hm, q_res, bias,
                prep["wq_h"], prep["wk_h"], prep["wv_h"], prep["wo3"], prep["bo"],
                prep["g1"], prep["be1"], prep["w1_t"], prep["b1"], prep["w2_t"],
                prep["b2"], prep["g2"], prep["be2"])

    # VMEM budget (double-buffered blocks + fp32 intermediates), capped below the
    # v7x 64 MiB physical VMEM.
    block_bytes = (2 * _nbytes((heads, Sk, D), cdt) + _nbytes((heads, tq, D), cdt)
                   + _nbytes((tq, E), cdt) + _nbytes((tq, Sk), cdt)
                   + 3 * _nbytes((heads, D, D), cdt) + _nbytes((heads, D, E), cdt)
                   + _nbytes((E, Hff), cdt) + _nbytes((Hff, E), cdt)
                   + 7 * _nbytes((1, E), jnp.float32) + _nbytes((1, Hff), jnp.float32)
                   + _nbytes((tq, E), jnp.float32))
    interm_bytes = (3 * _nbytes((heads, tq, Sk), jnp.float32)
                    + 4 * _nbytes((tq, Hff), jnp.float32)
                    + 4 * _nbytes((tq, E), jnp.float32))
    vmem_limit = int(min(60 * 1024 * 1024,
                         max(16 * 1024 * 1024,
                             2 * block_bytes + interm_bytes + (2 << 20))))

    flops = 2 * N * ((Sq + 2 * Sk) * E * D      # QKV projections
                     + 2 * Sq * Sk * E          # QK^T and PV
                     + Sq * E * E               # output projection
                     + 2 * Sq * E * Hff)        # feed-forward
    bytes_accessed = (sum(_nbytes(x.shape, x.dtype) for x in operands)
                      + _nbytes((N, Sq, E), jnp.float32))
    cost = pl.CostEstimate(flops=int(flops),
                           transcendentals=int(N * heads * Sq * Sk),
                           bytes_accessed=int(bytes_accessed))

    return pl.pallas_call(
        transformer_block_kernel,
        out_shape=jax.ShapeDtypeStruct((N, Sq, E), jnp.float32),
        grid_spec=pltpu.PrefetchScalarGridSpec(
            num_scalar_prefetch=0,
            grid=(N, nq),
            in_specs=in_specs,
            out_specs=pl.BlockSpec((1, tq, E), lambda b, qi: (b, qi, 0)),
        ),
        compiler_params=pltpu.CompilerParams(
            dimension_semantics=("parallel", "parallel"),
            vmem_limit_bytes=vmem_limit),
        cost_estimate=cost,
    )(*operands)


def reference(keys_t, values_t, queries_t, mask, params, heads,
              compute_dtype=jnp.bfloat16):
    """Plain-JAX TransformerBlock forward with the same bf16-operand / fp32-accumulate
    mixed precision as the kernel (matches the fp32 PyTorch module to bf16 rounding)."""
    N, Sq, E = queries_t.shape
    Sk = keys_t.shape[1]
    D = E // heads
    cdt = compute_dtype
    prep = _prepare_weights(params, heads, cdt)

    q = queries_t.astype(cdt)
    k = keys_t.astype(cdt)
    v = values_t.astype(cdt)
    qh = q.reshape(N, Sq, heads, D)
    kh = k.reshape(N, Sk, heads, D)
    vh = v.reshape(N, Sk, heads, D)
    qp = jnp.einsum("nshd,de->nshe", qh, prep["wq_t"],
                    preferred_element_type=jnp.float32).astype(cdt)
    kp = jnp.einsum("nshd,de->nshe", kh, prep["wk_t"],
                    preferred_element_type=jnp.float32).astype(cdt)
    vp = jnp.einsum("nshd,de->nshe", vh, prep["wv_t"],
                    preferred_element_type=jnp.float32).astype(cdt)

    energy = jnp.einsum("nqhd,nkhd->nhqk", qp, kp,
                        preferred_element_type=jnp.float32)
    energy = jnp.where(mask[:, None] == 0, -1e20, energy)   # scale folded into wq_t
    attn = jax.nn.softmax(energy, axis=-1)
    ctx = jnp.einsum("nhqk,nkhd->nqhd", attn.astype(cdt), vp,
                     preferred_element_type=jnp.float32)
    concat = ctx.reshape(N, Sq, E).astype(cdt)
    attn_out = jnp.einsum("nqe,ef->nqf", concat, prep["wo_t"],
                          preferred_element_type=jnp.float32) + prep["bo"]

    def ln(x, g, b):
        mu = jnp.mean(x, -1, keepdims=True)
        var = jnp.mean((x - mu) ** 2, -1, keepdims=True)
        return (x - mu) / jnp.sqrt(var + LN_EPS) * g + b

    x = ln(attn_out + q.astype(jnp.float32), prep["g1"], prep["be1"])
    h1 = jnp.maximum(
        jnp.einsum("nqe,eh->nqh", x.astype(cdt), prep["w1_t"],
                   preferred_element_type=jnp.float32) + prep["b1"], 0.0)
    ff = jnp.einsum("nqh,he->nqe", h1.astype(cdt), prep["w2_t"],
                    preferred_element_type=jnp.float32) + prep["b2"]
    return ln(ff + x, prep["g2"], prep["be2"])


if __name__ == "__main__":
    embed_size, heads, forward_expansion = 32, 4, 4
    N, S = 2, 8

    key = jax.random.PRNGKey(0)
    k0, k1, k2, k3 = jax.random.split(key, 4)
    keys_t = jax.random.normal(k0, (N, S, embed_size), jnp.float32)
    values_t = jax.random.normal(k1, (N, S, embed_size), jnp.float32)
    queries_t = jax.random.normal(k2, (N, S, embed_size), jnp.float32)
    # causal mask (1 = attend, 0 = masked), shared across heads
    mask = jnp.tril(jnp.ones((S, S), jnp.float32))[None].repeat(N, axis=0)

    params = init_params(k3, embed_size, heads, forward_expansion)

    out = transformer_block(keys_t, values_t, queries_t, mask, params, heads)
    out = jax.block_until_ready(out)

    ref = reference(keys_t, values_t, queries_t, mask, params, heads)
    assert out.shape == (N, S, embed_size)
    err = float(jnp.max(jnp.abs(out - ref)))
    assert err < 2e-2, err
    print("KERNEL_OK")
</pallas_src>

<mosaic_0001>
module attributes {stable_mosaic.version = 11 : i64} {
  func.func @transformer_block_kernel(%arg0: i32, %arg1: i32, %arg2: memref<1x4x8x8xbf16, #tpu.memory_space<vmem>>, %arg3: memref<1x4x8x8xbf16, #tpu.memory_space<vmem>>, %arg4: memref<1x4x8x8xbf16, #tpu.memory_space<vmem>>, %arg5: memref<1x8x32xbf16, #tpu.memory_space<vmem>>, %arg6: memref<1x8x8xbf16, #tpu.memory_space<vmem>>, %arg7: memref<4x8x8xbf16, #tpu.memory_space<vmem>>, %arg8: memref<4x8x8xbf16, #tpu.memory_space<vmem>>, %arg9: memref<4x8x8xbf16, #tpu.memory_space<vmem>>, %arg10: memref<4x8x32xbf16, #tpu.memory_space<vmem>>, %arg11: memref<1x32xf32, #tpu.memory_space<vmem>>, %arg12: memref<1x32xf32, #tpu.memory_space<vmem>>, %arg13: memref<1x32xf32, #tpu.memory_space<vmem>>, %arg14: memref<32x128xbf16, #tpu.memory_space<vmem>>, %arg15: memref<1x128xf32, #tpu.memory_space<vmem>>, %arg16: memref<128x32xbf16, #tpu.memory_space<vmem>>, %arg17: memref<1x32xf32, #tpu.memory_space<vmem>>, %arg18: memref<1x32xf32, #tpu.memory_space<vmem>>, %arg19: memref<1x32xf32, #tpu.memory_space<vmem>>, %arg20: memref<1x8x32xf32, #tpu.memory_space<vmem>>) attributes {dimension_semantics = [#tpu.dimension_semantics<parallel>, #tpu.dimension_semantics<parallel>], iteration_bounds = array<i64: 2, 1>, scalar_prefetch = 0 : i64, scratch_operands = 0 : i64, tpu.core_type = #tpu.core_type<tc>, window_params = [{transform_indices = @transform_0, window_bounds = array<i64: 1, 4, 8, 8>}, {transform_indices = @transform_1, window_bounds = array<i64: 1, 4, 8, 8>}, {transform_indices = @transform_2, window_bounds = array<i64: 1, 4, 8, 8>}, {transform_indices = @transform_3, window_bounds = array<i64: 1, 8, 32>}, {transform_indices = @transform_4, window_bounds = array<i64: 1, 8, 8>}, {pipeline_mode = #tpu.pipeline_mode<synchronous>, transform_indices = @transform_5, window_bounds = array<i64: 4, 8, 8>}, {pipeline_mode = #tpu.pipeline_mode<synchronous>, transform_indices = @transform_6, window_bounds = array<i64: 4, 8, 8>}, {pipeline_mode = #tpu.pipeline_mode<synchronous>, transform_indices = @transform_7, window_bounds = array<i64: 4, 8, 8>}, {pipeline_mode = #tpu.pipeline_mode<synchronous>, transform_indices = @transform_8, window_bounds = array<i64: 4, 8, 32>}, {pipeline_mode = #tpu.pipeline_mode<synchronous>, transform_indices = @transform_9, window_bounds = array<i64: 1, 32>}, {pipeline_mode = #tpu.pipeline_mode<synchronous>, transform_indices = @transform_10, window_bounds = array<i64: 1, 32>}, {pipeline_mode = #tpu.pipeline_mode<synchronous>, transform_indices = @transform_11, window_bounds = array<i64: 1, 32>}, {pipeline_mode = #tpu.pipeline_mode<synchronous>, transform_indices = @transform_12, window_bounds = array<i64: 32, 128>}, {pipeline_mode = #tpu.pipeline_mode<synchronous>, transform_indices = @transform_13, window_bounds = array<i64: 1, 128>}, {pipeline_mode = #tpu.pipeline_mode<synchronous>, transform_indices = @transform_14, window_bounds = array<i64: 128, 32>}, {pipeline_mode = #tpu.pipeline_mode<synchronous>, transform_indices = @transform_15, window_bounds = array<i64: 1, 32>}, {pipeline_mode = #tpu.pipeline_mode<synchronous>, transform_indices = @transform_16, window_bounds = array<i64: 1, 32>}, {pipeline_mode = #tpu.pipeline_mode<synchronous>, transform_indices = @transform_17, window_bounds = array<i64: 1, 32>}, {transform_indices = @transform_18, window_bounds = array<i64: 1, 8, 32>}]} {
    %c0 = arith.constant 0 : index
    %c0_0 = arith.constant 0 : index
    %c0_1 = arith.constant 0 : index
    %c0_2 = arith.constant 0 : index
    %0 = vector.load %arg2[%c0, %c0_0, %c0_1, %c0_2] : memref<1x4x8x8xbf16, #tpu.memory_space<vmem>>, vector<1x4x8x8xbf16>
    %1 = vector.shape_cast %0 : vector<1x4x8x8xbf16> to vector<4x8x8xbf16>
    %c0_3 = arith.constant 0 : index
    %c0_4 = arith.constant 0 : index
    %c0_5 = arith.constant 0 : index
    %c0_6 = arith.constant 0 : index
    %2 = vector.load %arg3[%c0_3, %c0_4, %c0_5, %c0_6] : memref<1x4x8x8xbf16, #tpu.memory_space<vmem>>, vector<1x4x8x8xbf16>
    %3 = vector.shape_cast %2 : vector<1x4x8x8xbf16> to vector<4x8x8xbf16>
    %c0_7 = arith.constant 0 : index
    %c0_8 = arith.constant 0 : index
    %c0_9 = arith.constant 0 : index
    %c0_10 = arith.constant 0 : index
    %4 = vector.load %arg4[%c0_7, %c0_8, %c0_9, %c0_10] : memref<1x4x8x8xbf16, #tpu.memory_space<vmem>>, vector<1x4x8x8xbf16>
    %5 = vector.shape_cast %4 : vector<1x4x8x8xbf16> to vector<4x8x8xbf16>
    %c0_11 = arith.constant 0 : index
    %c0_12 = arith.constant 0 : index
    %c0_13 = arith.constant 0 : index
    %6 = vector.load %arg6[%c0_11, %c0_12, %c0_13] : memref<1x8x8xbf16, #tpu.memory_space<vmem>>, vector<1x8x8xbf16>
    %7 = vector.shape_cast %6 : vector<1x8x8xbf16> to vector<8x8xbf16>
    %8 = arith.extf %7 : vector<8x8xbf16> to vector<8x8xf32>
    %c0_14 = arith.constant 0 : index
    %c0_15 = arith.constant 0 : index
    %c0_16 = arith.constant 0 : index
    %9 = vector.load %arg7[%c0_14, %c0_15, %c0_16] : memref<4x8x8xbf16, #tpu.memory_space<vmem>>, vector<4x8x8xbf16>
    "tpu.trace_start"() <{level = 10 : i32, message = "hqd,hde->hqe"}> : () -> ()
    %cst = arith.constant dense<0.000000e+00> : vector<4x8x8xf32>
    %10 = tpu.matmul %5, %9, %cst {dimension_numbers = #tpu.dot_dimension_numbers<[2], [1], [1], [2], [0, 0, 0, 1, 1, 2], [0], [0]>} : vector<4x8x8xbf16>, vector<4x8x8xbf16>, vector<4x8x8xf32> -> vector<4x8x8xf32>
    "tpu.trace_stop"() : () -> ()
    %11 = arith.truncf %10 : vector<4x8x8xf32> to vector<4x8x8xbf16>
    %c0_17 = arith.constant 0 : index
    %c0_18 = arith.constant 0 : index
    %c0_19 = arith.constant 0 : index
    %12 = vector.load %arg8[%c0_17, %c0_18, %c0_19] : memref<4x8x8xbf16, #tpu.memory_space<vmem>>, vector<4x8x8xbf16>
    "tpu.trace_start"() <{level = 10 : i32, message = "hkd,hde->hke"}> : () -> ()
    %cst_20 = arith.constant dense<0.000000e+00> : vector<4x8x8xf32>
    %13 = tpu.matmul %1, %12, %cst_20 {dimension_numbers = #tpu.dot_dimension_numbers<[2], [1], [1], [2], [0, 0, 0, 1, 1, 2], [0], [0]>} : vector<4x8x8xbf16>, vector<4x8x8xbf16>, vector<4x8x8xf32> -> vector<4x8x8xf32>
    "tpu.trace_stop"() : () -> ()
    %14 = arith.truncf %13 : vector<4x8x8xf32> to vector<4x8x8xbf16>
    %c0_21 = arith.constant 0 : index
    %c0_22 = arith.constant 0 : index
    %c0_23 = arith.constant 0 : index
    %15 = vector.load %arg9[%c0_21, %c0_22, %c0_23] : memref<4x8x8xbf16, #tpu.memory_space<vmem>>, vector<4x8x8xbf16>
    "tpu.trace_start"() <{level = 10 : i32, message = "hkd,hde->hke"}> : () -> ()
    %cst_24 = arith.constant dense<0.000000e+00> : vector<4x8x8xf32>
    %16 = tpu.matmul %3, %15, %cst_24 {dimension_numbers = #tpu.dot_dimension_numbers<[2], [1], [1], [2], [0, 0, 0, 1, 1, 2], [0], [0]>} : vector<4x8x8xbf16>, vector<4x8x8xbf16>, vector<4x8x8xf32> -> vector<4x8x8xf32>
    "tpu.trace_stop"() : () -> ()
    %17 = arith.truncf %16 : vector<4x8x8xf32> to vector<4x8x8xbf16>
    "tpu.trace_start"() <{level = 10 : i32, message = "hqd,hkd->hqk"}> : () -> ()
    %cst_25 = arith.constant dense<0.000000e+00> : vector<4x8x8xf32>
    %18 = tpu.matmul %11, %14, %cst_25 {dimension_numbers = #tpu.dot_dimension_numbers<[2], [2], [1], [1], [0, 0, 0, 1, 1, 1], [0], [0]>} : vector<4x8x8xbf16>, vector<4x8x8xbf16>, vector<4x8x8xf32> -> vector<4x8x8xf32>
    "tpu.trace_stop"() : () -> ()
    %19 = vector.shape_cast %8 : vector<8x8xf32> to vector<1x8x8xf32>
    %20 = vector.broadcast %19 : vector<1x8x8xf32> to vector<4x8x8xf32>
    %21 = arith.addf %18, %20 : vector<4x8x8xf32>
    %cst_26 = arith.constant dense<0xFF800000> : vector<4x8xf32>
    %22 = vector.multi_reduction <maximumf>, %21, %cst_26 [2] : vector<4x8x8xf32> to vector<4x8xf32>
    %23 = vector.shape_cast %22 : vector<4x8xf32> to vector<4x8x1xf32>
    %24 = vector.broadcast %23 : vector<4x8x1xf32> to vector<4x8x8xf32>
    %25 = arith.subf %21, %24 : vector<4x8x8xf32>
    %26 = math.exp %25 : vector<4x8x8xf32>
    %cst_27 = arith.constant dense<0.000000e+00> : vector<4x8xf32>
    %27 = vector.multi_reduction <add>, %26, %cst_27 [2] : vector<4x8x8xf32> to vector<4x8xf32>
    %28 = vector.shape_cast %27 : vector<4x8xf32> to vector<4x8x1xf32>
    %29 = tpu.reciprocal %28 {approx = true} : vector<4x8x1xf32> -> vector<4x8x1xf32>
    %30 = vector.broadcast %29 : vector<4x8x1xf32> to vector<4x8x8xf32>
    %31 = arith.mulf %26, %30 : vector<4x8x8xf32>
    %32 = arith.truncf %31 : vector<4x8x8xf32> to vector<4x8x8xbf16>
    "tpu.trace_start"() <{level = 10 : i32, message = "hqk,hkd->hqd"}> : () -> ()
    %cst_28 = arith.constant dense<0.000000e+00> : vector<4x8x8xf32>
    %33 = tpu.matmul %32, %17, %cst_28 {dimension_numbers = #tpu.dot_dimension_numbers<[2], [1], [1], [2], [0, 0, 0, 1, 1, 2], [0], [0]>} : vector<4x8x8xbf16>, vector<4x8x8xbf16>, vector<4x8x8xf32> -> vector<4x8x8xf32>
    "tpu.trace_stop"() : () -> ()
    %34 = arith.truncf %33 : vector<4x8x8xf32> to vector<4x8x8xbf16>
    %c0_29 = arith.constant 0 : index
    %c0_30 = arith.constant 0 : index
    %c0_31 = arith.constant 0 : index
    %35 = vector.load %arg10[%c0_29, %c0_30, %c0_31] : memref<4x8x32xbf16, #tpu.memory_space<vmem>>, vector<4x8x32xbf16>
    "tpu.trace_start"() <{level = 10 : i32, message = "hqd,hde->hqe"}> : () -> ()
    %cst_32 = arith.constant dense<0.000000e+00> : vector<4x8x32xf32>
    %36 = tpu.matmul %34, %35, %cst_32 {dimension_numbers = #tpu.dot_dimension_numbers<[2], [1], [1], [2], [0, 0, 0, 1, 1, 2], [0], [0]>} : vector<4x8x8xbf16>, vector<4x8x32xbf16>, vector<4x8x32xf32> -> vector<4x8x32xf32>
    "tpu.trace_stop"() : () -> ()
    %cst_33 = arith.constant dense<0.000000e+00> : vector<8x32xf32>
    %37 = vector.multi_reduction <add>, %36, %cst_33 [0] : vector<4x8x32xf32> to vector<8x32xf32>
    %c0_34 = arith.constant 0 : index
    %c0_35 = arith.constant 0 : index
    %38 = vector.load %arg11[%c0_34, %c0_35] : memref<1x32xf32, #tpu.memory_space<vmem>>, vector<1x32xf32>
    %39 = vector.broadcast %38 : vector<1x32xf32> to vector<8x32xf32>
    %40 = arith.addf %37, %39 : vector<8x32xf32>
    %c0_36 = arith.constant 0 : index
    %c0_37 = arith.constant 0 : index
    %c0_38 = arith.constant 0 : index
    %41 = vector.load %arg5[%c0_36, %c0_37, %c0_38] : memref<1x8x32xbf16, #tpu.memory_space<vmem>>, vector<1x8x32xbf16>
    %42 = vector.shape_cast %41 : vector<1x8x32xbf16> to vector<8x32xbf16>
    %43 = arith.extf %42 : vector<8x32xbf16> to vector<8x32xf32>
    %44 = arith.addf %40, %43 : vector<8x32xf32>
    %c0_39 = arith.constant 0 : index
    %c0_40 = arith.constant 0 : index
    %45 = vector.load %arg12[%c0_39, %c0_40] : memref<1x32xf32, #tpu.memory_space<vmem>>, vector<1x32xf32>
    %c0_41 = arith.constant 0 : index
    %c0_42 = arith.constant 0 : index
    %46 = vector.load %arg13[%c0_41, %c0_42] : memref<1x32xf32, #tpu.memory_space<vmem>>, vector<1x32xf32>
    %cst_43 = arith.constant dense<0.000000e+00> : vector<8xf32>
    %47 = vector.multi_reduction <add>, %44, %cst_43 [1] : vector<8x32xf32> to vector<8xf32>
    %48 = vector.shape_cast %47 : vector<8xf32> to vector<8x1xf32>
    %cst_44 = arith.constant 3.200000e+01 : f32
    %49 = vector.broadcast %cst_44 : f32 to vector<8x1xf32>
    %50 = arith.divf %48, %49 : vector<8x1xf32>
    %51 = vector.broadcast %50 : vector<8x1xf32> to vector<8x32xf32>
    %52 = arith.subf %44, %51 : vector<8x32xf32>
    %53 = arith.mulf %52, %52 : vector<8x32xf32>
    %cst_45 = arith.constant dense<0.000000e+00> : vector<8xf32>
    %54 = vector.multi_reduction <add>, %53, %cst_45 [1] : vector<8x32xf32> to vector<8xf32>
    %55 = vector.shape_cast %54 : vector<8xf32> to vector<8x1xf32>
    %cst_46 = arith.constant 3.200000e+01 : f32
    %56 = vector.broadcast %cst_46 : f32 to vector<8x1xf32>
    %57 = arith.divf %55, %56 : vector<8x1xf32>
    %58 = vector.broadcast %50 : vector<8x1xf32> to vector<8x32xf32>
    %59 = arith.subf %44, %58 : vector<8x32xf32>
    %cst_47 = arith.constant 9.99999974E-6 : f32
    %60 = vector.broadcast %cst_47 : f32 to vector<8x1xf32>
    %61 = arith.addf %57, %60 : vector<8x1xf32>
    %62 = math.rsqrt %61 : vector<8x1xf32>
    %63 = vector.broadcast %62 : vector<8x1xf32> to vector<8x32xf32>
    %64 = arith.mulf %59, %63 : vector<8x32xf32>
    %65 = vector.broadcast %45 : vector<1x32xf32> to vector<8x32xf32>
    %66 = arith.mulf %64, %65 : vector<8x32xf32>
    %67 = vector.broadcast %46 : vector<1x32xf32> to vector<8x32xf32>
    %68 = arith.addf %66, %67 : vector<8x32xf32>
    %69 = arith.truncf %68 : vector<8x32xf32> to vector<8x32xbf16>
    %c0_48 = arith.constant 0 : index
    %c0_49 = arith.constant 0 : index
    %70 = vector.load %arg14[%c0_48, %c0_49] : memref<32x128xbf16, #tpu.memory_space<vmem>>, vector<32x128xbf16>
    %cst_50 = arith.constant dense<0.000000e+00> : vector<8x128xf32>
    %71 = tpu.matmul %69, %70, %cst_50 {dimension_numbers = #tpu.dot_dimension_numbers<[1], [0], [0], [1], [0, 0, 1, 1], [], []>} : vector<8x32xbf16>, vector<32x128xbf16>, vector<8x128xf32> -> vector<8x128xf32>
    %c0_51 = arith.constant 0 : index
    %c0_52 = arith.constant 0 : index
    %72 = vector.load %arg15[%c0_51, %c0_52] : memref<1x128xf32, #tpu.memory_space<vmem>>, vector<1x128xf32>
    %73 = vector.broadcast %72 : vector<1x128xf32> to vector<8x128xf32>
    %74 = arith.addf %71, %73 : vector<8x128xf32>
    %cst_53 = arith.constant 0.000000e+00 : f32
    %75 = vector.broadcast %cst_53 : f32 to vector<8x128xf32>
    %76 = arith.maximumf %74, %75 : vector<8x128xf32>
    %77 = arith.truncf %76 : vector<8x128xf32> to vector<8x128xbf16>
    %c0_54 = arith.constant 0 : index
    %c0_55 = arith.constant 0 : index
    %78 = vector.load %arg16[%c0_54, %c0_55] : memref<128x32xbf16, #tpu.memory_space<vmem>>, vector<128x32xbf16>
    %cst_56 = arith.constant dense<0.000000e+00> : vector<8x32xf32>
    %79 = tpu.matmul %77, %78, %cst_56 {dimension_numbers = #tpu.dot_dimension_numbers<[1], [0], [0], [1], [0, 0, 1, 1], [], []>} : vector<8x128xbf16>, vector<128x32xbf16>, vector<8x32xf32> -> vector<8x32xf32>
    %c0_57 = arith.constant 0 : index
    %c0_58 = arith.constant 0 : index
    %80 = vector.load %arg17[%c0_57, %c0_58] : memref<1x32xf32, #tpu.memory_space<vmem>>, vector<1x32xf32>
    %81 = vector.broadcast %80 : vector<1x32xf32> to vector<8x32xf32>
    %82 = arith.addf %79, %81 : vector<8x32xf32>
    %83 = arith.addf %82, %68 : vector<8x32xf32>
    %c0_59 = arith.constant 0 : index
    %c0_60 = arith.constant 0 : index
    %84 = vector.load %arg18[%c0_59, %c0_60] : memref<1x32xf32, #tpu.memory_space<vmem>>, vector<1x32xf32>
    %c0_61 = arith.constant 0 : index
    %c0_62 = arith.constant 0 : index
    %85 = vector.load %arg19[%c0_61, %c0_62] : memref<1x32xf32, #tpu.memory_space<vmem>>, vector<1x32xf32>
    %cst_63 = arith.constant dense<0.000000e+00> : vector<8xf32>
    %86 = vector.multi_reduction <add>, %83, %cst_63 [1] : vector<8x32xf32> to vector<8xf32>
    %87 = vector.shape_cast %86 : vector<8xf32> to vector<8x1xf32>
    %cst_64 = arith.constant 3.200000e+01 : f32
    %88 = vector.broadcast %cst_64 : f32 to vector<8x1xf32>
    %89 = arith.divf %87, %88 : vector<8x1xf32>
    %90 = vector.broadcast %89 : vector<8x1xf32> to vector<8x32xf32>
    %91 = arith.subf %83, %90 : vector<8x32xf32>
    %92 = arith.mulf %91, %91 : vector<8x32xf32>
    %cst_65 = arith.constant dense<0.000000e+00> : vector<8xf32>
    %93 = vector.multi_reduction <add>, %92, %cst_65 [1] : vector<8x32xf32> to vector<8xf32>
    %94 = vector.shape_cast %93 : vector<8xf32> to vector<8x1xf32>
    %cst_66 = arith.constant 3.200000e+01 : f32
    %95 = vector.broadcast %cst_66 : f32 to vector<8x1xf32>
    %96 = arith.divf %94, %95 : vector<8x1xf32>
    %97 = vector.broadcast %89 : vector<8x1xf32> to vector<8x32xf32>
    %98 = arith.subf %83, %97 : vector<8x32xf32>
    %cst_67 = arith.constant 9.99999974E-6 : f32
    %99 = vector.broadcast %cst_67 : f32 to vector<8x1xf32>
    %100 = arith.addf %96, %99 : vector<8x1xf32>
    %101 = math.rsqrt %100 : vector<8x1xf32>
    %102 = vector.broadcast %101 : vector<8x1xf32> to vector<8x32xf32>
    %103 = arith.mulf %98, %102 : vector<8x32xf32>
    %104 = vector.broadcast %84 : vector<1x32xf32> to vector<8x32xf32>
    %105 = arith.mulf %103, %104 : vector<8x32xf32>
    %106 = vector.broadcast %85 : vector<1x32xf32> to vector<8x32xf32>
    %107 = arith.addf %105, %106 : vector<8x32xf32>
    %c0_68 = arith.constant 0 : index
    %c0_69 = arith.constant 0 : index
    %c0_70 = arith.constant 0 : index
    %108 = vector.load %arg20[%c0_68, %c0_69, %c0_70] : memref<1x8x32xf32, #tpu.memory_space<vmem>>, vector<1x8x32xf32>
    %109 = vector.shape_cast %108 : vector<1x8x32xf32> to vector<8x32xf32>
    %110 = vector.shape_cast %107 : vector<8x32xf32> to vector<1x8x32xf32>
    tpu.vector_store %arg20[%c0_68, %c0_69, %c0_70], %110 {strides = array<i32>} : memref<1x8x32xf32, #tpu.memory_space<vmem>>, vector<1x8x32xf32>,
    return
  }
  func.func @transform_0(%arg0: i32, %arg1: i32) -> (i32, i32, i32, i32) {
    %c0_i32 = arith.constant 0 : i32
    %c0_i32_0 = arith.constant 0 : i32
    %c0_i32_1 = arith.constant 0 : i32
    %c0_i32_2 = arith.constant 0 : i32
    return %arg0, %c0_i32, %c0_i32_0, %c0_i32_1 : i32, i32, i32, i32
  }
  func.func @transform_1(%arg0: i32, %arg1: i32) -> (i32, i32, i32, i32) {
    %c0_i32 = arith.constant 0 : i32
    %c0_i32_0 = arith.constant 0 : i32
    %c0_i32_1 = arith.constant 0 : i32
    %c0_i32_2 = arith.constant 0 : i32
    return %arg0, %c0_i32, %c0_i32_0, %c0_i32_1 : i32, i32, i32, i32
  }
  func.func @transform_2(%arg0: i32, %arg1: i32) -> (i32, i32, i32, i32) {
    %c0_i32 = arith.constant 0 : i32
    %c0_i32_0 = arith.constant 0 : i32
    %c0_i32_1 = arith.constant 0 : i32
    return %arg0, %c0_i32, %arg1, %c0_i32_0 : i32, i32, i32, i32
  }
  func.func @transform_3(%arg0: i32, %arg1: i32) -> (i32, i32, i32) {
    %c0_i32 = arith.constant 0 : i32
    %c0_i32_0 = arith.constant 0 : i32
    return %arg0, %arg1, %c0_i32 : i32, i32, i32
  }
  func.func @transform_4(%arg0: i32, %arg1: i32) -> (i32, i32, i32) {
    %c0_i32 = arith.constant 0 : i32
    %c0_i32_0 = arith.constant 0 : i32
    return %arg0, %arg1, %c0_i32 : i32, i32, i32
  }
  func.func @transform_5(%arg0: i32, %arg1: i32) -> (i32, i32, i32) {
    %c0_i32 = arith.constant 0 : i32
    %c0_i32_0 = arith.constant 0 : i32
    %c0_i32_1 = arith.constant 0 : i32
    %c0_i32_2 = arith.constant 0 : i32
    return %c0_i32, %c0_i32_0, %c0_i32_1 : i32, i32, i32
  }
  func.func @transform_6(%arg0: i32, %arg1: i32) -> (i32, i32, i32) {
    %c0_i32 = arith.constant 0 : i32
    %c0_i32_0 = arith.constant 0 : i32
    %c0_i32_1 = arith.constant 0 : i32
    %c0_i32_2 = arith.constant 0 : i32
    return %c0_i32, %c0_i32_0, %c0_i32_1 : i32, i32, i32
  }
  func.func @transform_7(%arg0: i32, %arg1: i32) -> (i32, i32, i32) {
    %c0_i32 = arith.constant 0 : i32
    %c0_i32_0 = arith.constant 0 : i32
    %c0_i32_1 = arith.constant 0 : i32
    %c0_i32_2 = arith.constant 0 : i32
    return %c0_i32, %c0_i32_0, %c0_i32_1 : i32, i32, i32
  }
  func.func @transform_8(%arg0: i32, %arg1: i32) -> (i32, i32, i32) {
    %c0_i32 = arith.constant 0 : i32
    %c0_i32_0 = arith.constant 0 : i32
    %c0_i32_1 = arith.constant 0 : i32
    %c0_i32_2 = arith.constant 0 : i32
    return %c0_i32, %c0_i32_0, %c0_i32_1 : i32, i32, i32
  }
  func.func @transform_9(%arg0: i32, %arg1: i32) -> (i32, i32) {
    %c0_i32 = arith.constant 0 : i32
    %c0_i32_0 = arith.constant 0 : i32
    %c0_i32_1 = arith.constant 0 : i32
    return %c0_i32, %c0_i32_0 : i32, i32
  }
  func.func @transform_10(%arg0: i32, %arg1: i32) -> (i32, i32) {
    %c0_i32 = arith.constant 0 : i32
    %c0_i32_0 = arith.constant 0 : i32
    %c0_i32_1 = arith.constant 0 : i32
    return %c0_i32, %c0_i32_0 : i32, i32
  }
  func.func @transform_11(%arg0: i32, %arg1: i32) -> (i32, i32) {
    %c0_i32 = arith.constant 0 : i32
    %c0_i32_0 = arith.constant 0 : i32
    %c0_i32_1 = arith.constant 0 : i32
    return %c0_i32, %c0_i32_0 : i32, i32
  }
  func.func @transform_12(%arg0: i32, %arg1: i32) -> (i32, i32) {
    %c0_i32 = arith.constant 0 : i32
    %c0_i32_0 = arith.constant 0 : i32
    %c0_i32_1 = arith.constant 0 : i32
    return %c0_i32, %c0_i32_0 : i32, i32
  }
  func.func @transform_13(%arg0: i32, %arg1: i32) -> (i32, i32) {
    %c0_i32 = arith.constant 0 : i32
    %c0_i32_0 = arith.constant 0 : i32
    %c0_i32_1 = arith.constant 0 : i32
    return %c0_i32, %c0_i32_0 : i32, i32
  }
  func.func @transform_14(%arg0: i32, %arg1: i32) -> (i32, i32) {
    %c0_i32 = arith.constant 0 : i32
    %c0_i32_0 = arith.constant 0 : i32
    %c0_i32_1 = arith.constant 0 : i32
    return %c0_i32, %c0_i32_0 : i32, i32
  }
  func.func @transform_15(%arg0: i32, %arg1: i32) -> (i32, i32) {
    %c0_i32 = arith.constant 0 : i32
    %c0_i32_0 = arith.constant 0 : i32
    %c0_i32_1 = arith.constant 0 : i32
    return %c0_i32, %c0_i32_0 : i32, i32
  }
  func.func @transform_16(%arg0: i32, %arg1: i32) -> (i32, i32) {
    %c0_i32 = arith.constant 0 : i32
    %c0_i32_0 = arith.constant 0 : i32
    %c0_i32_1 = arith.constant 0 : i32
    return %c0_i32, %c0_i32_0 : i32, i32
  }
  func.func @transform_17(%arg0: i32, %arg1: i32) -> (i32, i32) {
    %c0_i32 = arith.constant 0 : i32
    %c0_i32_0 = arith.constant 0 : i32
    %c0_i32_1 = arith.constant 0 : i32
    return %c0_i32, %c0_i32_0 : i32, i32
  }
  func.func @transform_18(%arg0: i32, %arg1: i32) -> (i32, i32, i32) {
    %c0_i32 = arith.constant 0 : i32
    %c0_i32_0 = arith.constant 0 : i32
    return %arg0, %arg1, %c0_i32 : i32, i32, i32
  }
}

</mosaic_0001>

<bundles_post_ra>
// kernel: tpu_custom_call.1
= control target key start
LH: loop header
LB: loop body
LE: loop exit
PB: predicated region body
PF: predicated region fallthrough
CT: control target
= control target key end

     0   :  { %s3855_s0 = inlined_call_operand.vmem [shape: bf16[2,4,8,8], index: 0, kind: input, shape index: {}]   ;;  %s3856_s1 = inlined_call_operand.vmem [shape: bf16[2,4,8,8], index: 1, kind: input, shape index: {}]   ;;  %s3857_s2 = inlined_call_operand.hbm [shape: bf16[2,4,8,8], index: 2, kind: input, shape index: {}]   ;;  %s3858_s3 = inlined_call_operand.hbm [shape: bf16[2,8,32], index: 3, kind: input, shape index: {}]   ;;  %s3859_s4 = inlined_call_operand.hbm [shape: bf16[2,8,8], index: 4, kind: input, shape index: {}]   ;;  %s3860_s5 = inlined_call_operand.vmem [shape: bf16[4,8,8], index: 5, kind: input, shape index: {}]   ;;  %s3861_s6 = inlined_call_operand.hbm [shape: bf16[4,8,8], index: 6, kind: input, shape index: {}]   ;;  %s3862_s7 = inlined_call_operand.hbm [shape: bf16[4,8,8], index: 7, kind: input, shape index: {}]   ;;  %s3863_s8 = inlined_call_operand.hbm [shape: bf16[4,8,32], index: 8, kind: input, shape index: {}]   ;;  %s3864_s9 = inlined_call_operand.vmem [shape: f32[1,32], index: 9, kind: input, shape index: {}]   ;;  %s3865_s10 = inlined_call_operand.vmem [shape: f32[1,32], index: 10, kind: input, shape index: {}]   ;;  %s3866_s11 = inlined_call_operand.vmem [shape: f32[1,32], index: 11, kind: input, shape index: {}]   ;;  %s3867_s12 = inlined_call_operand.vmem [shape: bf16[32,128], index: 12, kind: input, shape index: {}]   ;;  %s3868_s13 = inlined_call_operand.vmem [shape: f32[1,128], index: 13, kind: input, shape index: {}]   ;;  %s3869_s14 = inlined_call_operand.vmem [shape: bf16[128,32], index: 14, kind: input, shape index: {}]   ;;  %s3870_s15 = inlined_call_operand.vmem [shape: f32[1,32], index: 15, kind: input, shape index: {}]   ;;  %s3871_s16 = inlined_call_operand.vmem [shape: f32[1,32], index: 16, kind: input, shape index: {}]   ;;  %s3872_s17 = inlined_call_operand.vmem [shape: f32[1,32], index: 17, kind: input, shape index: {}]   ;;  %s3873_s18 = inlined_call_operand.hbm [shape: f32[2,8,32], index: 18, kind: output, shape index: {}]  }
   0x1   :  { %3901 = sst [smem:[#allocation26_spill]] %s3855_s0 }
   0x2   :  { %3902 = sst [smem:[#allocation27_spill]] %s3856_s1 }
   0x3   :  { %3903 = sst [smem:[#allocation28_spill]] %s3857_s2 }
   0x4   :  { %3904 = sst [smem:[#allocation29_spill]] %s3858_s3 }
   0x5   :  { %3905 = sst [smem:[#allocation30_spill]] %s3861_s6 }
   0x6   :  { %3906 = sst [smem:[#allocation31_spill]] %s3862_s7 }
   0x7   :  { %3907 = sst [smem:[#allocation32_spill]] %s3865_s10 }
   0x8   :  { %3908 = sst [smem:[#allocation33_spill]] %s3866_s11 }
   0x9   :  { %3909 = sst [smem:[#allocation34_spill]] %s3867_s12 }
   0xa   :  { %3910 = sst [smem:[#allocation35_spill]] %s3868_s13 }
   0xb   :  { %3911 = sst [smem:[#allocation36_spill]] %s3869_s14 }
   0xc   :  { %3912 = sst [smem:[#allocation37_spill]] %s3870_s15 }
   0xd   :  { %3913 = sst [smem:[#allocation38_spill]] %s3871_s16 }
   0xe   :  { %3914 = sst [smem:[#allocation39_spill]] %s3872_s17 }
   0xf   :  { %3915 = sst [smem:[#allocation40_spill]] %s3873_s18 }
  0x10   :  { %23 = vsyncpa [#allocation3], 0 }
  0x11   :  { %25 = vsyncpa [#allocation3 + $0x1], 0 }
  0x12   :  { %26 = vsyncpa [#allocation6], 0 }
  0x13   :  { %28 = vsyncpa [#allocation6 + $0x1], 0 }
  0x14   :  { %29 = vsyncpa [#allocation9], 0 }
  0x15   :  { %30 = vsyncpa [#allocation12], 0 }
  0x16   :  { %31 = vsyncpa [#allocation4], 0 }
  0x17   :  { %33 = vsyncpa [#allocation4 + $0x1], 0  ;;  %s3247_s27 = smov 0   ;;  %s3249_s28 = smov 0  }
  0x18   :  { %s3251_s29 = smov 0   ;;  %s3253_s30 = smov 0  }
  0x19   :  { %s3255_s0 = smov 0   ;;  %s3257_s19 = smov 0  }
  0x1a LB: > { %3916 = sst [smem:[#allocation19_spill]] %s3119_s27  ;;  %s3278_s1 = sadd.s32 4294967295, %s3139_s19   ;;  %s3139_s19 = sphi %s3257_s19, %s39_s19   ;;  %s3135_s0 = sphi %s3255_s0, %s3973_s0   ;;  %s3131_s30 = sphi %s3253_s30, %s3972_s30   ;;  %s3127_s29 = sphi %s3251_s29, %s3968_s29   ;;  %s3123_s28 = sphi %s3249_s28, %s3971_s28   ;;  %s3119_s27 = sphi %s3247_s27, %s3970_s27  }
  0x1b   : > { %3917 = sst [smem:[#allocation20_spill]] %s3127_s29  ;;  %s2428_s20 = sadd.s32 4294967294, %s3139_s19  }
  0x1c   : > { %3918 = sst [smem:[#allocation21_spill]] %s3139_s19  ;;  %p125_p0 = scmp.ne.s32.totalorder %s3123_s28, %s3119_s27 }
  0x1d   : > { %p3878_p1 = scmp.eq.s32.totalorder %s3278_s1, 0  ;;  %p486_p3 = scmp.eq.s32.totalorder %s2428_s20, 1 }
  0x1e   : > { %p2429_p5 = scmp.ge.s32.totalorder %s3139_s19, 1  ;;  %p493_p7 = scmp.lt.s32.totalorder %s3139_s19, 3 }
  0x1f   : > { %p3287_p4 = por %p3878_p1, %p125_p0  ;;  %p3292_p6 = por %p486_p3, %p125_p0 }
  0x20   : > { %p3297_p8 = pnand %p2429_p5, %p493_p7  ;;  %s3141_s23 = smov [#allocation8]  }
  0x21   : > { %s3919_s21 = scalar_select %p3287_p4, 1, 0 }
  0x22   : > { %s3920_s22 = scalar_select %p3292_p6, 1, 0 }
  0x23   : > { %s3922_s2 = scalar_select %p3297_p8, 1, 0 }
  0x24   : > { %3921 = sst [smem:[#allocation22_spill]] %s3920_s22  ;;  %s508_s24 = sshll.u32 %s3141_s23, 4  ;;  %s509_s24 = int_to_ptr.vmem [resolvable:$true] %s508_s24 }
  0x25   : > { %p2754_p9 = pneg %p3297_p8  ;;  %s51_s26 = sadd.s32 1, %s3135_s0 }
  0x26   : > { %s3924_s6 = sld [smem:[#allocation30_spill]] }
  0x27   : > { %p3306_p11 = pnand %p2754_p9, %p3878_p1 }
  0x29   : > { %s3923_s25 = scalar_select %p3306_p11, 1, 0 }
  0x2a   : > { %p3319_p13 = pneg %p3306_p11 }
  0x2c   : > { %s2871_s27 = scalar_lea.hbm %s3924_s6, 256 }
  0x2d   : > { %p2872_p12 = scmp.ne.s32.totalorder %s3924_s6, %s2871_s27  ;;  %p2878_p5 = scmp.lt.u32.totalorder %s2871_s27, %s3924_s6 }
  0x2e   : > { %s3925_s23 = scalar_select %p3319_p13, 1, 0 }
  0x2f   : > { %p2874_p0 = pnand %p3319_p13, %p2872_p12 }
  0x31   : > { %p2875_p3 = pneg %p2874_p0 }
  0x33   : > { %p2880_p7 = pnand %p2878_p5, %p2875_p3 }
  0x35   : > { %2883 = shalt.err (!%p2880_p7)
}
  0x36   : > { %s2884_s22 = scalar_lea.vmem %s509_s24, 256  ;;  %p2892_p2 = scmp.lt.s32.totalorder %s509_s24, %s509_s24 }
  0x37   : > { %p2885_p9 = scmp.ne.s32.totalorder %s509_s24, %s2884_s22  ;;  %p2893_p6 = scmp.lt.s32.totalorder %s2884_s22, %s2884_s22 }
  0x39   : > { %p2887_p10 = pnand %p2885_p9, %p3319_p13  ;;  %p2894_p4 = por %p2893_p6, %p2892_p2 }
  0x3b   : > { %p2888_p1 = pneg %p2887_p10 }
  0x3d   : > { %p2895_p8 = pnand %p2894_p4, %p2888_p1 }
  0x3f   : > { %2898 = shalt.err (!%p2895_p8)
}
  0x40   : > { %s3881_s17 = smov 64   ;;  %s3883_s15 = smov 4  }
  0x41   : > { %2757 = dma.hbm_to_vmem [thread:$0]  (!%p3306_p11), %s3924_s6, 256, %s509_s24, [#allocation9], %s3881_s17, %s3881_s17, %s3883_s15  }
  0x42   : > { %p53_p1 = scmp.ge.s32.totalorder %s51_s26, 2  ;;  %s112_s27 = sadd.s32 1, %s3127_s29 }
  0x43   : > { %p119_p2 = scmp.ne.s32.totalorder %s3127_s29, %s3123_s28  ;;  %p120_p4 = scmp.eq.s32.totalorder %s3139_s19, 0 }
  0x44   : > { %s3975_s26 = smov (%p53_p1, %s51_s26), 0  ;;  %p3927_p8 = scmp.eq.s32.totalorder %s3278_s1, 1 }
  0x45   : > { %3926 = sst [smem:[#allocation23_spill]] %s3975_s26  ;;  %p121_p6 = por %p120_p4, %p119_p2 }
  0x46   : > { %p3346_p10 = por %p3927_p8, %p119_p2  ;;  %s107_s22 = ssub.s32 %s3135_s0, %s3975_s26 }
  0x47   : > { %p2781_p12 = scmp.lt.s32.totalorder %s3139_s19, 2  ;;  %p110_p0 = scmp.eq.s32.totalorder %s107_s22, 0 }
  0x48   : > { %s3928_s20 = scalar_select %p3346_p10, 1, 0 }
  0x49   : > { %s3354_s13 = sand.u32 1, %s3127_s29   ;;  %p3356_p3 = pnand %p2781_p12, %p121_p6 }
  0x4a   : > { %3929 = sst [smem:[#allocation24_spill]] %s3928_s20  ;;  %s613_s16 = sand.u32 1, %s3139_s19  }
  0x4b   : > { %s3930_s24 = scalar_select %p3356_p3, 1, 0 }
  0x4c   : > { %s3362_s18 = scalar_select %p110_p0, %s3127_s29, %s112_s27  }
  0x4d   : > { %s3891_s17 = sshll.u32 %s3354_s13, 2  ;;  %s2438_s15 = sshll.u32 %s3135_s0, 6 }
  0x4e   : > { %3931 = sst [smem:[#allocation25_spill]] %s3362_s18  ;;  %s3932_s3 = sld [smem:[#allocation29_spill]] }
  0x4f   : > { %s617_s22 = scalar_lea.vmem [#allocation5], %s3891_s17  ;;  %s3378_s27 = scalar_lea.hbm %s3859_s4, %s2438_s15 }
  0x50   : > { %s625_s20 = sshll.u32 %s617_s22, 4  ;;  %s3380_s18 = scalar_lea.sflag [#allocation6], %s613_s16  ;;  %s3373_s20 = int_to_ptr.vmem [resolvable:$true] %s625_s20 }
  0x51   : > { %p3386_p7 = pneg %p3356_p3 }
  0x54   : > { %s3369_s26 = scalar_lea.hbm %s3932_s3, %s2438_s15  ;;  %s2904_s17 = scalar_lea.hbm %s3932_s3, 128 }
  0x55   : > { %s2899_s29 = scalar_lea.hbm %s3369_s26, 64  ;;  %p2905_p2 = scmp.lt.u32.totalorder %s3369_s26, %s3932_s3 }
  0x56   : > { %p2900_p5 = scmp.ne.s32.totalorder %s3369_s26, %s2899_s29  ;;  %p2906_p4 = scmp.lt.u32.totalorder %s2904_s17, %s2899_s29 }
  0x57   : > { %p2908_p8 = scmp.lt.u32.totalorder %s2899_s29, %s3369_s26 }
  0x58   : > { %p2902_p9 = pnand %p3386_p7, %p2900_p5  ;;  %p2907_p6 = por %p2906_p4, %p2905_p2 }
  0x5a   : > { %p2903_p1 = pneg %p2902_p9  ;;  %p2909_p12 = por %p2908_p8, %p2907_p6 }
  0x5c   : > { %p2910_p0 = pnand %p2909_p12, %p2903_p1 }
  0x5e   : > { %2913 = shalt.err (!%p2910_p0)
}
  0x5f   : > { %s2914_s15 = scalar_lea.vmem %s3373_s20, 64  ;;  %s3144_s16 = smov [#allocation5]  }
  0x60   : > { %p2915_p5 = scmp.ne.s32.totalorder %s3373_s20, %s2914_s15  ;;  %s2919_s11 = sshll.u32 %s3144_s16, 4  ;;  %s2920_s11 = int_to_ptr.vmem [resolvable:$false] %s2919_s11 }
  0x61   : > { %s2921_s22 = scalar_lea.vmem %s2920_s11, 128  ;;  %p2922_p11 = scmp.lt.s32.totalorder %s3373_s20, %s2920_s11 }
  0x62   : > { %p2917_p9 = pnand %p2915_p5, %p3386_p7  ;;  %p2923_p13 = scmp.lt.s32.totalorder %s2921_s22, %s2914_s15 }
  0x64   : > { %p2918_p10 = pneg %p2917_p9  ;;  %p2924_p2 = por %p2923_p13, %p2922_p11 }
  0x66   : > { %p2925_p4 = pnand %p2924_p2, %p2918_p10 }
  0x68   : > { %2928 = shalt.err (!%p2925_p4)
}
  0x69   : > { %2770 = dma.hbm_to_vmem [thread:$0]  (!%p3356_p3), %s3369_s26, 64, %s3373_s20, %s3380_s18  }
  0x6a   : > { %s3145_s29 = smov [#allocation10]   ;;  %s3146_s10 = smov [#allocation11]  }
  0x6b   : > { %s521_s17 = sshll.u32 %s3145_s29, 4  ;;  %s534_s19 = sshll.u32 %s3146_s10, 4  ;;  %s522_s17 = int_to_ptr.vmem [resolvable:$true] %s521_s17  ;;  %s3410_s19 = int_to_ptr.vmem [resolvable:$true] %s534_s19 }
  0x6c   : > { %s3934_s7 = sld [smem:[#allocation31_spill]]  ;;  %p3935_p13 = scmp.ne.s32.totalorder %s3925_s23, 0 }
  0x72   : > { %s2929_s15 = scalar_lea.hbm %s3934_s7, 256 }
  0x73   : > { %p2930_p11 = scmp.ne.s32.totalorder %s3934_s7, %s2929_s15  ;;  %p2936_p6 = scmp.lt.u32.totalorder %s2929_s15, %s3934_s7 }
  0x75   : > { %p2932_p10 = pnand %p2930_p11, %p3935_p13 }
  0x77   : > { %p2933_p1 = pneg %p2932_p10 }
  0x79   : > { %p2938_p8 = pnand %p2936_p6, %p2933_p1 }
  0x7b   : > { %2941 = shalt.err (!%p2938_p8)
}
  0x7c   : > { %s2942_s20 = scalar_lea.vmem %s522_s17, 256  ;;  %p2950_p9 = scmp.lt.s32.totalorder %s522_s17, %s522_s17 }
  0x7d   : > { %p2943_p12 = scmp.ne.s32.totalorder %s522_s17, %s2942_s20  ;;  %p2951_p2 = scmp.lt.s32.totalorder %s2942_s20, %s2942_s20 }
  0x7f   : > { %p2945_p0 = pnand %p2943_p12, %p3935_p13  ;;  %p2952_p4 = por %p2951_p2, %p2950_p9 }
  0x81   : > { %p2946_p5 = pneg %p2945_p0 }
  0x83   : > { %p2953_p3 = pnand %p2952_p4, %p2946_p5 }
  0x85   : > { %2956 = shalt.err (!%p2953_p3)
}
  0x86   : > { %p3936_p11 = scmp.ne.s32.totalorder %s3923_s25, 0  ;;  %s3937_s3 = smov 4  }
  0x87   : > { %s3938_s29 = smov 64   ;;  %s2957_s15 = scalar_lea.hbm %s3863_s8, 256 }
  0x88   : > { %2760 = dma.hbm_to_vmem [thread:$0]  (!%p3936_p11), %s3934_s7, 256, %s522_s17, [#allocation9], %s3938_s29, %s3938_s29, %s3937_s3  }
  0x89   : > { %p2958_p10 = scmp.ne.s32.totalorder %s3863_s8, %s2957_s15  ;;  %p2964_p6 = scmp.lt.u32.totalorder %s2957_s15, %s3863_s8 }
  0x8b   : > { %p2960_p3 = pnand %p2958_p10, %p3935_p13 }
  0x8d   : > { %p2961_p1 = pneg %p2960_p3 }
  0x8f   : > { %p2966_p8 = pnand %p2964_p6, %p2961_p1 }
  0x91   : > { %2969 = shalt.err (!%p2966_p8)
}
  0x92   : > { %s2970_s17 = scalar_lea.vmem %s3410_s19, 256  ;;  %p2978_p9 = scmp.lt.s32.totalorder %s3410_s19, %s3410_s19 }
  0x93   : > { %p2971_p12 = scmp.ne.s32.totalorder %s3410_s19, %s2970_s17  ;;  %p2979_p2 = scmp.lt.s32.totalorder %s2970_s17, %s2970_s17 }
  0x95   : > { %p2973_p0 = pnand %p2971_p12, %p3935_p13  ;;  %p2980_p4 = por %p2979_p2, %p2978_p9 }
  0x97   : > { %p2974_p5 = pneg %p2973_p0 }
  0x99   : > { %p2981_p10 = pnand %p2980_p4, %p2974_p5 }
  0x9b   : > { %2984 = shalt.err (!%p2981_p10)
}
  0x9c   : > { %2763 = dma.hbm_to_vmem [thread:$0]  (!%p3936_p11), %s3863_s8, 256, %s3410_s19, [#allocation12], %s3938_s29, %s3938_s29, %s3937_s3  }
  0x9d   : > { %s2434_s23 = sshll.u32 %s3354_s13, 4  ;;  %s2499_s10 = sshll.u32 %s3135_s0, 8 }
  0x9e   : > { %s3939_s15 = sld [smem:[#allocation28_spill]]  ;;  %s595_s25 = scalar_lea.vmem [#allocation2], %s2434_s23 }
  0x9f   : > { %s603_s26 = sshll.u32 %s595_s25, 4  ;;  %s3940_s20 = sshll.u32 %s3354_s13, 2  ;;  %s3466_s26 = int_to_ptr.vmem [resolvable:$true] %s603_s26 }
  0xa0   : > { %s3470_s17 = scalar_lea.vmem [#allocation7], %s3940_s20  ;;  %s592_s12 = scalar_lea.sflag [#allocation3], %s3354_s13 }
  0xa1   : > { %s644_s19 = sshll.u32 %s3470_s17, 4  ;;  %s645_s19 = int_to_ptr.vmem [resolvable:$true] %s644_s19 }
  0xa4   : > { %s3464_s22 = scalar_lea.hbm %s3939_s15, %s2499_s10  ;;  %s2990_s11 = scalar_lea.hbm %s3939_s15, 512 }
  0xa5   : > { %s2985_s14 = scalar_lea.hbm %s3464_s22, 256  ;;  %p2991_p1 = scmp.lt.u32.totalorder %s3464_s22, %s3939_s15 }
  0xa6   : > { %p2986_p13 = scmp.ne.s32.totalorder %s3464_s22, %s2985_s14  ;;  %p2992_p6 = scmp.lt.u32.totalorder %s2990_s11, %s2985_s14 }
  0xa7   : > { %p2994_p12 = scmp.lt.u32.totalorder %s2985_s14, %s3464_s22 }
  0xa8   : > { %p2988_p11 = pnand %p2986_p13, %p3386_p7  ;;  %p2993_p8 = por %p2992_p6, %p2991_p1 }
  0xaa   : > { %p2989_p3 = pneg %p2988_p11  ;;  %p2995_p0 = por %p2994_p12, %p2993_p8 }
  0xac   : > { %p2996_p5 = pnand %p2995_p0, %p2989_p3 }
  0xae   : > { %2999 = shalt.err (!%p2996_p5)
}
  0xaf   : > { %s3000_s25 = scalar_lea.vmem %s3466_s26, 256  ;;  %s3147_s20 = smov [#allocation2]  }
  0xb0   : > { %p3001_p9 = scmp.ne.s32.totalorder %s3466_s26, %s3000_s25  ;;  %s3005_s10 = sshll.u32 %s3147_s20, 4  ;;  %s3006_s10 = int_to_ptr.vmem [resolvable:$false] %s3005_s10 }
  0xb1   : > { %s3007_s7 = scalar_lea.vmem %s3006_s10, 512  ;;  %p3008_p10 = scmp.lt.s32.totalorder %s3466_s26, %s3006_s10 }
  0xb2   : > { %p3003_p2 = pnand %p3001_p9, %p3386_p7  ;;  %p3009_p13 = scmp.lt.s32.totalorder %s3007_s7, %s3000_s25 }
  0xb4   : > { %p3004_p4 = pneg %p3003_p2  ;;  %p3010_p11 = por %p3009_p13, %p3008_p10 }
  0xb6   : > { %p3011_p1 = pnand %p3010_p11, %p3004_p4 }
  0xb8   : > { %3014 = shalt.err (!%p3011_p1)
}
  0xb9   : > { %p3941_p3 = scmp.ne.s32.totalorder %s3930_s24, 0  ;;  %s3015_s14 = scalar_lea.hbm %s3378_s27, 64 }
  0xba   : > { %p3016_p6 = scmp.ne.s32.totalorder %s3378_s27, %s3015_s14  ;;  %s3020_s13 = scalar_lea.hbm %s3859_s4, 128 }
  0xbb   : > { %2767 = dma.hbm_to_vmem [thread:$0]  (!%p3941_p3), %s3464_s22, 256, %s3466_s26, %s592_s12, %s3938_s29, %s3938_s29, %s3937_s3  }
  0xbc   : > { %p3018_p8 = pnand %p3016_p6, %p3386_p7  ;;  %p3021_p0 = scmp.lt.u32.totalorder %s3378_s27, %s3859_s4 }
  0xbd   : > { %p3022_p5 = scmp.lt.u32.totalorder %s3020_s13, %s3015_s14  ;;  %p3024_p2 = scmp.lt.u32.totalorder %s3015_s14, %s3378_s27 }
  0xbe   : > { %p3019_p12 = pneg %p3018_p8 }
  0xbf   : > { %p3023_p9 = por %p3022_p5, %p3021_p0 }
  0xc1   : > { %p3025_p4 = por %p3024_p2, %p3023_p9 }
  0xc3   : > { %p3026_p10 = pnand %p3025_p4, %p3019_p12 }
  0xc5   : > { %3029 = shalt.err (!%p3026_p10)
}
  0xc6   : > { %s3030_s3 = scalar_lea.vmem %s645_s19, 64  ;;  %s3148_s29 = smov [#allocation7]  }
  0xc7   : > { %p3031_p13 = scmp.ne.s32.totalorder %s645_s19, %s3030_s3  ;;  %s3035_s22 = sshll.u32 %s3148_s29, 4  ;;  %s3036_s22 = int_to_ptr.vmem [resolvable:$false] %s3035_s22 }
  0xc8   : > { %s3037_s26 = scalar_lea.vmem %s3036_s22, 128  ;;  %p3038_p6 = scmp.lt.s32.totalorder %s645_s19, %s3036_s22 }
  0xc9   : > { %p3033_p11 = pnand %p3031_p13, %p3386_p7  ;;  %p3039_p8 = scmp.lt.s32.totalorder %s3037_s26, %s3030_s3 }
  0xcb   : > { %p3034_p1 = pneg %p3033_p11  ;;  %p3040_p3 = por %p3039_p8, %p3038_p6 }
  0xcd   : > { %p3041_p0 = pnand %p3040_p3, %p3034_p1 }
  0xcf   : > { %3044 = shalt.err (!%p3041_p0)
}
  0xd0   : > { %p3942_p5 = scmp.ne.s32.totalorder %s3930_s24, 0  ;;  %p3943_p12 = scmp.ne.s32.totalorder %s3922_s2, 0 }
  0xd1   : > { %s3523_s6 = sand.u32 (!%p3943_p12), 1, %s3123_s28   ;;  %p3944_p7 = scmp.ne.s32.totalorder (!%p3943_p12), %s3919_s21, 0 }
  0xd2   : > { %2773 = dma.hbm_to_vmem [thread:$0]  (!%p3942_p5), %s3378_s27, 64, %s645_s19, %s3380_s18  }
  0xd3   : > { %653 = sbr.rel (%p3943_p12) target bundleno = 2531 (0x9e3), region = 92  ;;  %s2442_s17 = sshll.u32 (!%p3943_p12), %s3523_s6, 4 }
  0xd4   : > { %s656_s12 = scalar_lea.sflag (!%p3943_p12), [#allocation3], %s3523_s6  ;;  %s3527_s20 = scalar_lea.vmem (!%p3943_p12), [#allocation2], %s2442_s17 }
  0xda   : > { %3098 = dma.done.wait (%p3944_p7), %s656_s12, 256  }
  0xdb   : > { %3100 = vsyncadd (%p3944_p7), %s656_s12, 4294967040  ;;  %s664_s2 = sand.u32 1, %s3278_s1   ;;  %s2443_s24 = sshll.u32 %s3523_s6, 2 }
  0xdc   : > { %s665_s18 = scalar_lea.sflag [#allocation6], %s664_s2  ;;  %s3535_s27 = scalar_lea.vmem [#allocation5], %s2443_s24 }
  0xdd   : > { %3102 = dma.done.wait (%p3944_p7), %s665_s18, 128  }
  0xde   : > { %3104 = vsyncadd (%p3944_p7), %s665_s18, 4294967168  ;;  %s3541_s19 = scalar_lea.vmem [#allocation7], %s2443_s24  ;;  %p3945_p3 = scmp.eq.s32.totalorder %s3278_s1, 0 }
  0xe0   : > { %3106 = dma.done.wait (%p3945_p3), [#allocation9], 512   ;;  %p3946_p9 = pmov %p3945_p3 }
  0xe1   : > { %p3947_p2 = pmov %p3945_p3 }
  0xe2   : > { %3108 = vsyncadd (%p3946_p9), [#allocation9], 4294966784 }
  0xe3   : > { %3110 = dma.done.wait (%p3947_p2), [#allocation12], 256   ;;  %p3948_p4 = pmov %p3947_p2 }
  0xe4   : > { %v3149_v0 = vmov 0.0   ;;  %p762_p10 = scmp.lt.s32.totalorder %s3131_s30, 1  ;;  %vm3150_vm0 = vmmov 0   ;;  %vm795_vm1 = vcmask 1043456   ;;  %v787_v1 = vld [vmem:[%s3860_s5] sm:$0xf] }
  0xe5   : > { %3112 = vsyncadd (%p3948_p4), [#allocation12], 4294967040  ;;  %2562 = vmatprep.subr.bf16.mxu0 %v3149_v0  ;;  %2580 = vmatprep.subr.bf16.mxu1 %v3149_v0  ;;  %v790_v2 = vld [vmem:[%s3860_s5 + $0xc] sm:$0xf]  ;;  %v797_v3 = vsel %vm795_vm1, %v787_v1, 0  ;;  %vm791_vm2 = vcmask 64512  }
  0xe6   : > { %2564 = vmatprep.mubr.msk.bf16.mxu0 %vm3150_vm0, %v3149_v0  ;;  %2582 = vmatprep.mubr.msk.bf16.mxu1 %vm3150_vm0, %v3149_v0  ;;  %s3559_s21 = scalar_select %p762_p10, %s3131_s30, 1  ;;  %v935_v4 = vsel %vm795_vm1, %v790_v2, 0  ;;  %v788_v5 = vld [vmem:[%s3860_s5 + $0x4] sm:$0xf]  ;;  %v781_v6 = vld [vmem:[%s3527_s20] sm:$0xf] }
  0xe7   : > { %2563 = vmatpush3.bf16.msra.mxu0 %v797_v3  ;;  %2581 = vmatpush3.bf16.msra.mxu1 %v935_v4  ;;  %v784_v7 = vld [vmem:[%s3527_s20 + $0xc] sm:$0xf]  ;;  %v982_v8 = vld [vmem:[#allocation8 + $0x4] sm:$0xf]  ;;  %v843_v9 = vsel %vm795_vm1, %v788_v5, 0  ;;  %s3949_s3 = sld [smem:[#allocation26_spill]] }
  0xe8   : > { %s2500_s13 = sshll.u32 %s3559_s21, 4  ;;  %2568 = vmatprep.subr.bf16.mxu0 %v3149_v0  ;;  %2592 = vmatprep.subr.bf16.mxu1 %v3149_v0  ;;  %v1035_v10 = vsel %vm795_vm1, %v982_v8, 0  ;;  %v789_v11 = vld [vmem:[%s3860_s5 + $0x8] sm:$0xf]  ;;  %v984_v12 = vld [vmem:[#allocation8 + $0xc] sm:$0xf] }
  0xe9   : > { %v782_v13 = vld [vmem:[%s3527_s20 + $0x4] sm:$0xf]  ;;  %v889_v15 = vsel %vm795_vm1, %v789_v11, 0  ;;  %v1127_v16 = vsel %vm795_vm1, %v984_v12, 0  ;;  %v981_v17 = vld [vmem:[#allocation8] sm:$0xf] }
  0xea   : > { %2565 = vmatmul.mubr.msk.bf16.vlgmr.msra.gmra.mrb[0].mxu0 %vm791_vm2, %v781_v6  ;;  %2583 = vmatmul.mubr.msk.bf16.vlgmr.msra.gmra.mrb[0].mxu1 %vm791_vm2, %v784_v7  ;;  %v1174_v18 = vld [vmem:[#allocation10 + $0x4] sm:$0xf]  ;;  %v783_v19 = vld [vmem:[%s3527_s20 + $0x8] sm:$0xf]  ;;  %v989_v21 = vsel %vm795_vm1, %v981_v17, 0  ;;  %s3950_s20 = sld [smem:[#allocation27_spill]] }
  0xeb   : > { %2569 = vmatpush3.bf16.msra.mxu0 %v843_v9  ;;  %2593 = vmatpush3.bf16.msra.mxu1 %v1035_v10  ;;  %v1227_v22 = vsel %vm795_vm1, %v1174_v18, 0  ;;  %v983_v23 = vld [vmem:[#allocation8 + $0x8] sm:$0xf]  ;;  %v1176_v27 = vld [vmem:[#allocation10 + $0xc] sm:$0xf]  ;;  %vm1973_vm3 = vcmask 261120  }
  0xec   : > { %2570 = vmatprep.mubr.msk.bf16.mxu0 %vm3150_vm0, %v3149_v0  ;;  %2594 = vmatprep.mubr.msk.bf16.mxu1 %vm3150_vm0, %v3149_v0  ;;  %v1081_v25 = vsel %vm795_vm1, %v983_v23, 0  ;;  %v1319_v29 = vsel %vm795_vm1, %v1176_v27, 0  ;;  %v1173_v31 = vld [vmem:[#allocation10] sm:$0xf]  ;;  %v1175_v34 = vld [vmem:[#allocation10 + $0x8] sm:$0xf] }
  0xed   : > { %s3586_s29 = scalar_lea.vmem %s3949_s3, %s2500_s13  ;;  %2574 = vmatprep.subr.bf16.mxu0 %v3149_v0  ;;  %2604 = vmatprep.subr.bf16.mxu1 %v3149_v0  ;;  %v1181_v32 = vsel %vm795_vm1, %v1173_v31, 0  ;;  %v1273_v35 = vsel %vm795_vm1, %v1175_v34, 0  ;;  %s3951_s21 = sld [smem:[#allocation34_spill]] }
  0xee   : > { %v774_v14 = vld [vmem:[%s3586_s29 + $0x4] sm:$0xf]  ;;  %v776_v20 = vld [vmem:[%s3586_s29 + $0xc] sm:$0xf]  ;;  %v773_v24 = vld [vmem:[%s3586_s29] sm:$0xf] }
  0xef   : > { %v775_v26 = vld [vmem:[%s3586_s29 + $0x8] sm:$0xf]  ;;  %s3952_s16 = sld [smem:[#allocation36_spill]]  ;;  %s3953_s24 = sld [smem:[#allocation32_spill]] }
  0xf0   : > { %s771_s2 = scalar_lea.vmem %s3950_s20, %s2500_s13  ;;  %s3955_s23 = sld [smem:[#allocation35_spill]] }
  0xf1   : > { %v778_v28 = vld [vmem:[%s771_s2 + $0x4] sm:$0xf]  ;;  %v780_v30 = vld [vmem:[%s771_s2 + $0xc] sm:$0xf]  ;;  %v777_v33 = vld [vmem:[%s771_s2] sm:$0xf] }
  0xf2   : > { %2571 = vmatmul.mubr.msk.bf16.vlgmr.msra.gmra.mrb[4].mxu0 %vm791_vm2, %v782_v13  ;;  %2595 = vmatmul.mubr.msk.bf16.vlgmr.msra.gmra.mrb[4].mxu1 %vm791_vm2, %v774_v14  ;;  %v779_v36 = vld [vmem:[%s771_s2 + $0x8] sm:$0xf]  ;;  %s3956_s29 = sld [smem:[#allocation37_spill]]  ;;  %s2448_s22 = sshll.u32 %s3523_s6, 3 }
  0xf3   : > { %2575 = vmatpush3.bf16.msra.mxu0 %v889_v15  ;;  %2605 = vmatpush3.bf16.msra.mxu1 %v1127_v16  ;;  %s3957_s26 = sld [smem:[#allocation24_spill]]  ;;  %s3958_s20 = sld [smem:[#allocation38_spill]] }
  0xf4   : > { %2576 = vmatprep.mubr.msk.bf16.mxu0 %vm3150_vm0, %v3149_v0  ;;  %2606 = vmatprep.mubr.msk.bf16.mxu1 %vm3150_vm0, %v3149_v0  ;;  %s3959_s18 = sld [smem:[#allocation39_spill]]  ;;  %s3960_s14 = sld [smem:[#allocation40_spill]] }
  0xf5   : > { %2586 = vmatprep.subr.bf16.mxu0 %v3149_v0  ;;  %2616 = vmatprep.subr.bf16.mxu1 %v3149_v0  ;;  %s2234_s13 = scalar_lea.sflag [#allocation4], %s3523_s6 }
  0xf9   : > { %p3961_p11 = scmp.ne.s32.totalorder %s3957_s26, 0 }
  0xfa   : > { %2577 = vmatmul.mubr.msk.bf16.vlgmr.msra.gmra.mrb[8].mxu0 %vm791_vm2, %v783_v19  ;;  %2607 = vmatmul.mubr.msk.bf16.vlgmr.msra.gmra.mrb[8].mxu1 %vm791_vm2, %v776_v20 }
  0xfb   : > { %2587 = vmatpush3.bf16.msra.mxu0 %v989_v21  ;;  %2588 = vmatprep.mubr.msk.bf16.mxu0 %vm3150_vm0, %v3149_v0 }
  0xfc   : > { %2598 = vmatprep.subr.bf16.mxu0 %v3149_v0  ;;  %2617 = vmatpush3.bf16.msra.mxu1 %v1227_v22 }
  0xfd   : > { %2618 = vmatprep.mubr.msk.bf16.mxu1 %vm3150_vm0, %v3149_v0  ;;  %2628 = vmatprep.subr.bf16.mxu1 %v3149_v0 }
 0x102   : > { %2589 = vmatmul.mubr.msk.bf16.vlgmr.msra.gmra.mrb[12].mxu0 %vm791_vm2, %v773_v24  ;;  %2619 = vmatmul.mubr.msk.bf16.vlgmr.msra.gmra.mrb[12].mxu1 %vm791_vm2, %v778_v28 }
 0x103   : > { %2599 = vmatpush3.bf16.msra.mxu0 %v1081_v25  ;;  %2600 = vmatprep.mubr.msk.bf16.mxu0 %vm3150_vm0, %v3149_v0 }
 0x104   : > { %2610 = vmatprep.subr.bf16.mxu0 %v3149_v0  ;;  %2629 = vmatpush3.bf16.msra.mxu1 %v1319_v29 }
 0x105   : > { %2630 = vmatprep.mubr.msk.bf16.mxu1 %vm3150_vm0, %v3149_v0  ;;  %2640 = vmatprep.subr.bf16.mxu1 %v3149_v0 }
 0x10a   : > { %2601 = vmatmul.mubr.msk.bf16.vlgmr.msra.gmra.mrb[16].mxu0 %vm791_vm2, %v775_v26  ;;  %2631 = vmatmul.mubr.msk.bf16.vlgmr.msra.gmra.mrb[16].mxu1 %vm791_vm2, %v780_v30 }
 0x10b   : > { %2612 = vmatprep.mubr.msk.bf16.mxu0 %vm3150_vm0, %v3149_v0  ;;  %2642 = vmatprep.mubr.msk.bf16.mxu1 %vm3150_vm0, %v3149_v0 }
 0x10c   : > { %2611 = vmatpush3.bf16.msra.mxu0 %v1181_v32 }
 0x10d   : > { %2622 = vmatprep.subr.bf16.mxu0 %v3149_v0 }
 0x112   : > { %2613 = vmatmul.mubr.msk.bf16.vlgmr.msra.gmra.mrb[20].mxu0 %vm791_vm2, %v777_v33 }
 0x113   : > { %2624 = vmatprep.mubr.msk.bf16.mxu0 %vm3150_vm0, %v3149_v0  ;;  %2623 = vmatpush3.bf16.msra.mxu0 %v1273_v35 }
 0x114   : > { %2634 = vmatprep.subr.bf16.mxu0 %v3149_v0 }
 0x11a   : > { %2625 = vmatmul.mubr.msk.bf16.vlgmr.msra.gmra.mrb[24].mxu0 %vm791_vm2, %v779_v36 }
 0x11b   : > { %2636 = vmatprep.mubr.msk.bf16.mxu0 %vm3150_vm0, %v3149_v0 }
 0x1bd   : > { %v833_v37 = vpop.f32.mrb[0].mxu0  ;;  %v971_v38 = vpop.f32.mrb[0].mxu1 }
 0x1be   : > { %v2566_v39 = vpop.f32.mrb[1].mxu0  ;;  %v2584_v40 = vpop.f32.mrb[1].mxu1  ;;  %v980_v4 = vpack.c.bf16 %v971_v38, %v971_v38  ;;  %v977_v11 = vpack.c.bf16 %v833_v37, %v833_v37 }
 0x1bf   : > { %v836_v41 = vpop.f32.mrb[2].mxu0  ;;  %v974_v42 = vpop.f32.mrb[2].mxu1 }
 0x1c0   : > { %v2567_v43 = vpop.f32.mrb[3].mxu0  ;;  %v2585_v44 = vpop.f32.mrb[3].mxu1 }
 0x1c5   : > { %v879_v45 = vpop.f32.mrb[4].mxu0  ;;  %v1071_v46 = vpop.f32.mrb[4].mxu1 }
 0x1c6   : > { %v1170_v47 = vpack.c.bf16 %v1071_v46, %v1071_v46  ;;  %v2572_v48 = vpop.f32.mrb[5].mxu0  ;;  %v2596_v49 = vpop.f32.mrb[5].mxu1  ;;  %v978_v57 = vpack.c.bf16 %v879_v45, %v879_v45  ;;  %v785_v46 = vld [vmem:[%s3541_s19] sm:$0xf]  ;;  %s3954_s19 = sld [smem:[#allocation33_spill]] }
 0x1c7   : > { %v882_v50 = vpop.f32.mrb[6].mxu0  ;;  %v1074_v51 = vpop.f32.mrb[6].mxu1 }
 0x1c8   : > { %v1415_v52 = vsel %vm791_vm2, %v1170_v47, 0  ;;  %v2573_v53 = vpop.f32.mrb[7].mxu0  ;;  %v2597_v54 = vpop.f32.mrb[7].mxu1  ;;  %v786_v47 = vunpack.c.l.bf16 %v785_v46 }
 0x1c9   : > { %2641 = vmatpush3.bf16.xpose.msra.mxu1 %v1415_v52 }
 0x1ca   : > { %2652 = vmatprep.subr.bf16.mxu1 %v3149_v0 }
 0x1cd   : > { %v925_v55 = vpop.f32.mrb[8].mxu0  ;;  %v1163_v56 = vpop.f32.mrb[8].mxu1 }
 0x1ce   : > { %v1172_v58 = vpack.c.bf16 %v1163_v56, %v1163_v56  ;;  %v2578_v59 = vpop.f32.mrb[9].mxu0  ;;  %v2608_v60 = vpop.f32.mrb[9].mxu1  ;;  %v979_v17 = vpack.c.bf16 %v925_v55, %v925_v55 }
 0x1cf   : > { %v928_v61 = vpop.f32.mrb[10].mxu0  ;;  %v1166_v62 = vpop.f32.mrb[10].mxu1 }
 0x1d0   : > { %v1507_v63 = vsel %vm791_vm2, %v1172_v58, 0  ;;  %v2579_v1 = vpop.f32.mrb[11].mxu0  ;;  %2643 = vmatmul.mubr.msk.bf16.vlgmr.msra.gmra.mrb[20].mxu1 %vm791_vm2, %v978_v57  ;;  %v2609_v2 = vpop.f32.mrb[11].mxu1 }
 0x1d1   : > { %2653 = vmatpush3.bf16.xpose.msra.mxu1 %v1507_v63  ;;  %2654 = vmatprep.mubr.msk.bf16.mxu1 %vm3150_vm0, %v3149_v0 }
 0x1d2   : > { %2664 = vmatprep.subr.bf16.mxu1 %v3149_v0 }
 0x1d5   : > { %v1025_v3 = vpop.f32.mrb[12].mxu0  ;;  %v1263_v18 = vpop.f32.mrb[12].mxu1 }
 0x1d6   : > { %v1169_v5 = vpack.c.bf16 %v1025_v3, %v1025_v3  ;;  %v2590_v6 = vpop.f32.mrb[13].mxu0  ;;  %v1362_v19 = vpack.c.bf16 %v1263_v18, %v1263_v18  ;;  %v2620_v20 = vpop.f32.mrb[13].mxu1 }
 0x1d7   : > { %v1028_v7 = vpop.f32.mrb[14].mxu0  ;;  %v1266_v21 = vpop.f32.mrb[14].mxu1 }
 0x1d8   : > { %v1369_v8 = vsel %vm791_vm2, %v1169_v5, 0  ;;  %v2591_v9 = vpop.f32.mrb[15].mxu0  ;;  %2655 = vmatmul.mubr.msk.bf16.vlgmr.msra.gmra.mrb[24].mxu1 %vm791_vm2, %v980_v4  ;;  %v1647_v22 = vsel %vm795_vm1, %v1362_v19, 0  ;;  %v2621_v23 = vpop.f32.mrb[15].mxu1 }
 0x1d9   : > { %2635 = vmatpush3.bf16.xpose.msra.mxu0 %v1369_v8  ;;  %2666 = vmatprep.mubr.msk.bf16.mxu1 %vm3150_vm0, %v3149_v0 }
 0x1da   : > { %2646 = vmatprep.subr.bf16.mxu0 %v3149_v0  ;;  %2665 = vmatpush3.bf16.msra.mxu1 %v1647_v22 }
 0x1db   : > { %2676 = vmatprep.subr.bf16.mxu1 %v3149_v0 }
 0x1dd   : > { %v1117_v10 = vpop.f32.mrb[16].mxu0  ;;  %v3676_v24 = vpop.f32.mrb[16].mxu1 }
 0x1de   : > { %v1171_v12 = vpack.c.bf16 %v1117_v10, %v1117_v10  ;;  %v2602_v13 = vpop.f32.mrb[17].mxu0  ;;  %v2632_v25 = vpop.f32.mrb[17].mxu1 }
 0x1df   : > { %v1120_v14 = vpop.f32.mrb[18].mxu0  ;;  %v1358_v26 = vpop.f32.mrb[18].mxu1 }
 0x1e0   : > { %v1461_v15 = vsel %vm791_vm2, %v1171_v12, 0  ;;  %v2603_v16 = vpop.f32.mrb[19].mxu0  ;;  %2637 = vmatmul.mubr.msk.bf16.vlgmr.msra.gmra.mrb[28].mxu0 %vm791_vm2, %v977_v11  ;;  %v2633_v27 = vpop.f32.mrb[19].mxu1 }
 0x1e1   : > { %2647 = vmatpush3.bf16.xpose.msra.mxu0 %v1461_v15  ;;  %2648 = vmatprep.mubr.msk.bf16.mxu0 %vm3150_vm0, %v3149_v0 }
 0x1e2   : > { %2658 = vmatprep.subr.bf16.mxu0 %v3149_v0 }
 0x1e5   : > { %v1217_v28 = vpop.f32.mrb[20].mxu0 }
 0x1e6   : > { %v1361_v29 = vpack.c.bf16 %v1217_v28, %v1217_v28  ;;  %v2614_v30 = vpop.f32.mrb[21].mxu0 }
 0x1e7   : > { %v1220_v31 = vpop.f32.mrb[22].mxu0 }
 0x1e8   : > { %2649 = vmatmul.mubr.msk.bf16.vlgmr.msra.gmra.mrb[32].mxu0 %vm791_vm2, %v979_v17  ;;  %v1601_v32 = vsel %vm795_vm1, %v1361_v29, 0  ;;  %v2615_v33 = vpop.f32.mrb[23].mxu0  ;;  %v1364_v31 = vpack.c.bf16 %v3676_v24, %v3676_v24 }
 0x1e9   : > { %2660 = vmatprep.mubr.msk.bf16.mxu0 %vm3150_vm0, %v3149_v0  ;;  %2659 = vmatpush3.bf16.msra.mxu0 %v1601_v32 }
 0x1ea   : > { %2670 = vmatprep.subr.bf16.mxu0 %v3149_v0 }
 0x1ed   : > { %v3680_v34 = vpop.f32.mrb[24].mxu0 }
 0x1ee   : > { %v2626_v35 = vpop.f32.mrb[25].mxu0  ;;  %v1363_v26 = vpack.c.bf16 %v3680_v34, %v3680_v34 }
 0x1ef   : > { %v1312_v36 = vpop.f32.mrb[26].mxu0 }
 0x1f0   : > { %v2627_v37 = vpop.f32.mrb[27].mxu0  ;;  %v1693_v32 = vsel %vm795_vm1, %v1363_v26, 0  ;;  %v1785_v36 = vld [vmem:[#allocation11] sm:$0xf] }
 0x1f1   : > { %v1739_v37 = vsel %vm795_vm1, %v1364_v31, 0 }
 0x2a3   : > { %v1451_v38 = vpop.f32.mrb[20].mxu1 }
 0x2a4   : > { %v2644_v39 = vpop.f32.mrb[21].mxu1  ;;  %v1452_v52 = vadd.f32 %v1451_v38, %v786_v47 }
 0x2a5   : > { %v1454_v40 = vpop.f32.mrb[22].mxu1  ;;  %v1793_v39 = vsel %vm795_vm1, %v1785_v36, 0 }
 0x2a6   : > { %v2645_v41 = vpop.f32.mrb[23].mxu1  ;;  %v1552_v55 = vsel %vm791_vm2, %v1452_v52, -inf }
 0x2ab   : > { %v1543_v42 = vpop.f32.mrb[24].mxu1 }
 0x2ac   : > { %v2656_v43 = vpop.f32.mrb[25].mxu1  ;;  %v1544_v60 = vadd.f32 %v1543_v42, %v786_v47 }
 0x2ad   : > { %v1546_v44 = vpop.f32.mrb[26].mxu1  ;;  %v1786_v43 = vld [vmem:[#allocation11 + $0x4] sm:$0xf] }
 0x2ae   : > { %v2657_v45 = vpop.f32.mrb[27].mxu1  ;;  %v1558_v63 = vsel %vm791_vm2, %v1544_v60, -inf  ;;  %v1839_v44 = vsel %vm795_vm1, %v1786_v43, 0  ;;  %v2844_v43 = vld [vmem:[%s3952_s16 + $0x8] sm:$0xff]  }
 0x2af   : > { %v1787_v45 = vld [vmem:[#allocation11 + $0x8] sm:$0xf] }
 0x2b3   : > { %v1405_v48 = vpop.f32.mrb[28].mxu0 }
 0x2b4   : > { %v1406_v49 = vadd.f32 %v1405_v48, %v786_v47  ;;  %v2638_v50 = vpop.f32.mrb[29].mxu0 }
 0x2b5   : > { %v1408_v51 = vpop.f32.mrb[30].mxu0 }
 0x2b6   : > { %v2639_v53 = vpop.f32.mrb[31].mxu0  ;;  %v1549_v54 = vsel %vm791_vm2, %v1406_v49, -inf  ;;  %v1788_v51 = vld [vmem:[#allocation11 + $0xc] sm:$0xf] }
 0x2b7   : > { %1550 = vmax.xlane.f32.xlu0 %v1549_v54 }
 0x2bb   : > { %1553 = vmax.xlane.f32.xlu0 %v1552_v55  ;;  %v1497_v56 = vpop.f32.mrb[32].mxu0 }
 0x2bc   : > { %v1498_v57 = vadd.f32 %v1497_v56, %v786_v47  ;;  %v2650_v58 = vpop.f32.mrb[33].mxu0  ;;  %v1931_v56 = vsel %vm795_vm1, %v1788_v51, 0 }
 0x2bd   : > { %v1500_v59 = vpop.f32.mrb[34].mxu0 }
 0x2be   : > { %v2651_v61 = vpop.f32.mrb[35].mxu0  ;;  %v1555_v62 = vsel %vm791_vm2, %v1498_v57, -inf }
 0x2bf   : > { %1556 = vmax.xlane.f32.xlu1 %v1555_v62 }
 0x2c3   : > { %1559 = vmax.xlane.f32.xlu1 %v1558_v63 }
 0x344   : > { %v1551_v1 = vpop.xlane.xlu0 %1550 }
 0x345   : > { %v1561_v2 = vsub.f32 %v1406_v49, %v1551_v1  ;;  %v1885_v49 = vsel %vm795_vm1, %v1787_v45, 0  ;;  %v2846_v45 = vld [vmem:[%s3952_s16 + $0x18] sm:$0xff]  }
 0x347   : > { %v1565_v3 = vmul.f32 1.442695, %v1561_v2 }
 0x348   : > { %v1554_v4 = vpop.xlane.xlu0 %1553 }
 0x349   : > { %2851 = vpow2.f32 %v1565_v3  ;;  %v1562_v5 = vsub.f32 %v1452_v52, %v1554_v4 }
 0x34b   : > { %v1567_v6 = vmul.f32 1.442695, %v1562_v5 }
 0x34c   : > { %v1557_v7 = vpop.xlane.xlu1 %1556 }
 0x34d   : > { %2853 = vpow2.f32 %v1567_v6  ;;  %v1563_v8 = vsub.f32 %v1498_v57, %v1557_v7 }
 0x34f   : > { %v1569_v9 = vmul.f32 1.442695, %v1563_v8 }
 0x350   : > { %v1560_v10 = vpop.xlane.xlu1 %1559 }
 0x351   : > { %2855 = vpow2.f32 %v1569_v9  ;;  %v1564_v11 = vsub.f32 %v1544_v60, %v1560_v10 }
 0x353   : > { %v2852_v12 = vpop.eup %2851  ;;  %v1571_v13 = vmul.f32 1.442695, %v1564_v11 }
 0x354   : > { %v1573_v14 = vsel %vm791_vm2, %v2852_v12, 0.0 }
 0x355   : > { %2857 = vpow2.f32 %v1571_v13  ;;  %1574 = vadd.xlane.f32.xlu0 %v1573_v14 }
 0x357   : > { %v2854_v15 = vpop.eup %2853 }
 0x358   : > { %v1576_v16 = vsel %vm791_vm2, %v2854_v15, 0.0 }
 0x359   : > { %1577 = vadd.xlane.f32.xlu1 %v1576_v16 }
 0x35b   : > { %v2856_v17 = vpop.eup %2855 }
 0x35c   : > { %v1579_v18 = vsel %vm791_vm2, %v2856_v17, 0.0 }
 0x35d   : > { %1580 = vadd.xlane.f32.xlu0 %v1579_v18 }
 0x35f   : > { %v2858_v19 = vpop.eup %2857 }
 0x360   : > { %v1582_v20 = vsel %vm791_vm2, %v2858_v19, 0.0 }
 0x361   : > { %1583 = vadd.xlane.f32.xlu1 %v1582_v20 }
 0x3e2   : > { %v1575_v21 = vpop.xlane.xlu0 %1574 }
 0x3e3   : > { %2859 = vrcp.f32 %v1575_v21 }
 0x3e6   : > { %v1578_v22 = vpop.xlane.xlu1 %1577 }
 0x3e7   : > { %2861 = vrcp.f32 %v1578_v22 }
 0x3ea   : > { %v1581_v23 = vpop.xlane.xlu0 %1580 }
 0x3eb   : > { %2863 = vrcp.f32 %v1581_v23  ;;  %v1989_v23 = vld [vmem:[%s3535_s27] sm:$0xf]  ;;  %s2496_s27 = sshll.u32 %s3131_s30, 7  ;;  %s3151_s30 = smov [#allocation13]  }
 0x3ec   : > { %v1990_v31 = vunpack.c.l.bf16 %v1989_v23  ;;  %v2494_v23 = vld [vmem:[%s3959_s18] ss:$0 sm:$0xff]  ;;  %s3805_s11 = scalar_lea.hbm %s3960_s14, %s2496_s27  ;;  %s3049_s25 = sshll.u32 %s3151_s30, 4  ;;  %s3050_s25 = int_to_ptr.vmem [resolvable:$false] %s3049_s25 }
 0x3ed   : > { %v2860_v25 = vpop.eup %2859  ;;  %s3051_s3 = scalar_lea.vmem %s3050_s25, 256 }
 0x3ee   : > { %v1589_v27 = vmul.f32 %v2860_v25, %v2852_v12  ;;  %v1584_v28 = vpop.xlane.xlu1 %1583 }
 0x3ef   : > { %2865 = vrcp.f32 %v1584_v28 }
 0x3f0   : > { %v1593_v29 = vpack.c.bf16 %v1589_v27, %v1589_v27  ;;  %v2477_v27 = vld [vmem:[%s3864_s9] ss:$0 sm:$0xff] }
 0x3f1   : > { %v2862_v30 = vpop.eup %2861 }
 0x3f2   : > { %v1590_v33 = vmul.f32 %v2862_v30, %v2854_v15  ;;  %2661 = vmatmul.mubr.msk.bf16.vlgmr.msra.gmra.mrb[36].mxu0 %vm791_vm2, %v1593_v29 }
 0x3f3   : > { %2671 = vmatpush3.bf16.msra.mxu0 %v1693_v32  ;;  %2672 = vmatprep.mubr.msk.bf16.mxu0 %vm3150_vm0, %v3149_v0 }
 0x3f4   : > { %v1594_v35 = vpack.c.bf16 %v1590_v33, %v1590_v33  ;;  %2682 = vmatprep.subr.bf16.mxu0 %v3149_v0 }
 0x3f5   : > { %v2864_v34 = vpop.eup %2863 }
 0x3f6   : > { %v1591_v38 = vmul.f32 %v2864_v34, %v2856_v17  ;;  %2667 = vmatmul.mubr.msk.bf16.vlgmr.msra.gmra.mrb[28].mxu1 %vm791_vm2, %v1594_v35 }
 0x3f7   : > { %2677 = vmatpush3.bf16.msra.mxu1 %v1739_v37  ;;  %2678 = vmatprep.mubr.msk.bf16.mxu1 %vm3150_vm0, %v3149_v0 }
 0x3f8   : > { %v1595_v24 = vpack.c.bf16 %v1591_v38, %v1591_v38  ;;  %2688 = vmatprep.subr.bf16.mxu1 %v3149_v0 }
 0x3f9   : > { %v2866_v40 = vpop.eup %2865 }
 0x3fa   : > { %v1592_v41 = vmul.f32 %v2866_v40, %v2858_v19  ;;  %2673 = vmatmul.mubr.msk.bf16.vlgmr.msra.gmra.mrb[40].mxu0 %vm791_vm2, %v1595_v24  ;;  %v2841_v40 = vld [vmem:[%s3951_s21] sm:$0xff]  }
 0x3fb   : > { %2683 = vmatpush3.bf16.msra.mxu0 %v1793_v39  ;;  %2684 = vmatprep.mubr.msk.bf16.mxu0 %vm3150_vm0, %v3149_v0 }
 0x3fc   : > { %v1596_v42 = vpack.c.bf16 %v1592_v41, %v1592_v41  ;;  %2694 = vmatprep.subr.bf16.mxu0 %v3149_v0  ;;  %v2842_v41 = vld [vmem:[%s3951_s21 + $0x8] sm:$0xff]  }
 0x3fe   : > { %2679 = vmatmul.mubr.msk.bf16.vlgmr.msra.gmra.mrb[32].mxu1 %vm791_vm2, %v1596_v42  ;;  %v2843_v42 = vld [vmem:[%s3952_s16] sm:$0xff]  }
 0x3ff   : > { %2690 = vmatprep.mubr.msk.bf16.mxu1 %vm3150_vm0, %v3149_v0  ;;  %2689 = vmatpush3.bf16.msra.mxu1 %v1839_v44  ;;  %v2845_v44 = vld [vmem:[%s3952_s16 + $0x10] sm:$0xff]  }
 0x400   : > { %2700 = vmatprep.subr.bf16.mxu1 %v3149_v0 }
 0x4c5   : > { %v1637_v46 = vpop.f32.mrb[36].mxu0 }
 0x4c6   : > { %v1781_v47 = vpack.c.bf16 %v1637_v46, %v1637_v46  ;;  %v2662_v48 = vpop.f32.mrb[37].mxu0  ;;  %v2847_v46 = vld [vmem:[%s3952_s16 + $0x20] sm:$0xff]  }
 0x4c7   : > { %v1640_v50 = vpop.f32.mrb[38].mxu0 }
 0x4c8   : > { %v2663_v52 = vpop.f32.mrb[39].mxu0  ;;  %2685 = vmatmul.mubr.msk.bf16.vlgmr.msra.gmra.mrb[44].mxu0 %vm791_vm2, %v1781_v47  ;;  %v2848_v47 = vld [vmem:[%s3952_s16 + $0x28] sm:$0xff]  }
 0x4c9   : > { %v1683_v53 = vpop.f32.mrb[28].mxu1  ;;  %2695 = vmatpush3.bf16.msra.mxu0 %v1885_v49  ;;  %2696 = vmatprep.mubr.msk.bf16.mxu0 %vm3150_vm0, %v3149_v0  ;;  %v2478_v52 = vld [vmem:[%s3953_s24] ss:$0 sm:$0xff] }
 0x4ca   : > { %v1782_v54 = vpack.c.bf16 %v1683_v53, %v1683_v53  ;;  %v2668_v55 = vpop.f32.mrb[29].mxu1  ;;  %2706 = vmatprep.subr.bf16.mxu0 %v3149_v0 }
 0x4cb   : > { %v1686_v57 = vpop.f32.mrb[30].mxu1 }
 0x4cc   : > { %v2669_v58 = vpop.f32.mrb[31].mxu1  ;;  %2691 = vmatmul.mubr.msk.bf16.vlgmr.msra.gmra.mrb[36].mxu1 %vm791_vm2, %v1782_v54  ;;  %v2479_v54 = vld [vmem:[%s3954_s19] ss:$0 sm:$0xff]  ;;  %s761_s19 = scalar_lea.vmem [#allocation13], %s2448_s22 }
 0x4cd   : > { %v1729_v59 = vpop.f32.mrb[40].mxu0  ;;  %2701 = vmatpush3.bf16.msra.mxu1 %v1931_v56  ;;  %2702 = vmatprep.mubr.msk.bf16.mxu1 %vm3150_vm0, %v3149_v0  ;;  %v2849_v58 = vld [vmem:[%s3952_s16 + $0x30] sm:$0xff]   ;;  %s2248_s1 = sshll.u32 %s761_s19, 4  ;;  %s3807_s1 = int_to_ptr.vmem [resolvable:$true] %s2248_s1 }
 0x4ce   : > { %v1783_v60 = vpack.c.bf16 %v1729_v59, %v1729_v59  ;;  %v2674_v61 = vpop.f32.mrb[41].mxu0  ;;  %2714 = vmatprep.subr.bf16.mxu1 %v3149_v0  ;;  %v2850_v59 = vld [vmem:[%s3952_s16 + $0x38] sm:$0xff]   ;;  %p3052_p8 = scmp.lt.s32.totalorder %s3807_s1, %s3050_s25 }
 0x4cf   : > { %v1732_v62 = vpop.f32.mrb[42].mxu0 }
 0x4d0   : > { %v2675_v63 = vpop.f32.mrb[43].mxu0  ;;  %2697 = vmatmul.mubr.msk.bf16.vlgmr.msra.gmra.mrb[48].mxu0 %vm791_vm2, %v1783_v60  ;;  %v2480_v60 = vld [vmem:[%s3955_s23] ss:$0 sm:$0xff]  ;;  %s3045_s23 = scalar_lea.vmem %s3807_s1, 128 }
 0x4d1   : > { %v1775_v1 = vpop.f32.mrb[32].mxu1  ;;  %2710 = vmatprep.mubr.msk.bf16.mxu0 %vm3150_vm0, %v3149_v0  ;;  %2707 = vmatpush3.bf16.msra.mxu0 %v2841_v40  ;;  %p3046_p13 = scmp.ne.s32.totalorder %s3807_s1, %s3045_s23  ;;  %p3053_p0 = scmp.lt.s32.totalorder %s3051_s3, %s3045_s23 }
 0x4d2   : > { %v1784_v2 = vpack.c.bf16 %v1775_v1, %v1775_v1  ;;  %v2680_v3 = vpop.f32.mrb[33].mxu1  ;;  %2708 = vmatprep.subr.bf16.mxu0 %v3149_v0 }
 0x4d3   : > { %v1778_v4 = vpop.f32.mrb[34].mxu1  ;;  %p3047_p1 = pnand %p3046_p13, %p3961_p11  ;;  %p3054_p5 = por %p3053_p0, %p3052_p8 }
 0x4d4   : > { %v2681_v5 = vpop.f32.mrb[35].mxu1  ;;  %2703 = vmatmul.mubr.msk.bf16.vlgmr.msra.gmra.mrb[40].mxu1 %vm791_vm2, %v1784_v2 }
 0x4d5   : > { %2730 = vmatprep.mubr.msk.bf16.mxu1 %vm3150_vm0, %v3149_v0  ;;  %2709 = vmatpush3.bf16.msra.mxu0 %v2842_v41  ;;  %p3048_p6 = pneg %p3047_p1 }
 0x4d6   : > { %2715 = vmatpush3.bf16.msra.mxu1 %v2843_v42 }
 0x4d7   : > { %2716 = vmatprep.subr.bf16.mxu1 %v3149_v0  ;;  %p3055_p12 = pnand %p3054_p5, %p3048_p6 }
 0x4da   : > { %2717 = vmatpush3.bf16.msra.mxu1 %v2844_v43 }
 0x4db   : > { %2718 = vmatprep.subr.bf16.mxu1 %v3149_v0 }
 0x4de   : > { %2719 = vmatpush3.bf16.msra.mxu1 %v2845_v44 }
 0x4df   : > { %2720 = vmatprep.subr.bf16.mxu1 %v3149_v0 }
 0x4e2   : > { %2721 = vmatpush3.bf16.msra.mxu1 %v2846_v45 }
 0x4e3   : > { %2722 = vmatprep.subr.bf16.mxu1 %v3149_v0 }
 0x4e6   : > { %2723 = vmatpush3.bf16.msra.mxu1 %v2847_v46 }
 0x4e7   : > { %2724 = vmatprep.subr.bf16.mxu1 %v3149_v0 }
 0x4ea   : > { %2725 = vmatpush3.bf16.msra.mxu1 %v2848_v47 }
 0x4eb   : > { %2726 = vmatprep.subr.bf16.mxu1 %v3149_v0 }
 0x4ee   : > { %2727 = vmatpush3.bf16.msra.mxu1 %v2849_v58 }
 0x4ef   : > { %2728 = vmatprep.subr.bf16.mxu1 %v3149_v0  ;;  %v2484_v0 = vld [vmem:[%s3956_s29] ss:$0 sm:$0xff] }
 0x4f2   : > { %2729 = vmatpush3.bf16.msra.mxu1 %v2850_v59 }
 0x59b   : > { %v1829_v6 = vpop.f32.mrb[44].mxu0 }
 0x59c   : > { %v2686_v7 = vpop.f32.mrb[45].mxu0  ;;  %v1974_v11 = vsel %vm1973_vm3, %v1829_v6, 0.0 }
 0x59d   : > { %v1832_v8 = vpop.f32.mrb[46].mxu0 }
 0x59e   : > { %v2687_v9 = vpop.f32.mrb[47].mxu0 }
 0x59f   : > { %v1875_v10 = vpop.f32.mrb[36].mxu1 }
 0x5a0   : > { %v1975_v12 = vsel %vm1973_vm3, %v1875_v10, 0.0  ;;  %v2692_v13 = vpop.f32.mrb[37].mxu1 }
 0x5a1   : > { %v1976_v14 = vadd.f32 %v1975_v12, %v1974_v11  ;;  %v1878_v15 = vpop.f32.mrb[38].mxu1 }
 0x5a2   : > { %v2693_v16 = vpop.f32.mrb[39].mxu1 }
 0x5a3   : > { %v1921_v17 = vpop.f32.mrb[48].mxu0 }
 0x5a4   : > { %v1977_v18 = vsel %vm1973_vm3, %v1921_v17, 0.0  ;;  %v2698_v19 = vpop.f32.mrb[49].mxu0 }
 0x5a5   : > { %v1978_v20 = vadd.f32 %v1977_v18, %v1976_v14  ;;  %v1924_v21 = vpop.f32.mrb[50].mxu0 }
 0x5a6   : > { %v2699_v22 = vpop.f32.mrb[51].mxu0  ;;  %v2493_v21 = vld [vmem:[%s3958_s20] ss:$0 sm:$0xff] }
 0x5a7   : > { %v1967_v25 = vpop.f32.mrb[40].mxu1 }
 0x5a8   : > { %v1979_v26 = vsel %vm1973_vm3, %v1967_v25, 0.0  ;;  %v2704_v28 = vpop.f32.mrb[41].mxu1 }
 0x5a9   : > { %v1980_v29 = vadd.f32 %v1979_v26, %v1978_v20  ;;  %v1970_v30 = vpop.f32.mrb[42].mxu1 }
 0x5aa   : > { %v2705_v32 = vpop.f32.mrb[43].mxu1 }
 0x5ab   : > { %v1988_v33 = vadd.f32 %v2477_v27, %v1980_v29 }
 0x5ad   : > { %v1991_v35 = vadd.f32 %v1990_v31, %v1988_v33 }
 0x5af   : > { %v1994_v34 = vsel %vm1973_vm3, %v1991_v35, 0.0 }
 0x5b0   : > { %1995 = vadd.xlane.f32.xlu0 %v1994_v34 }
 0x63d   : > { %v1996_v36 = vpop.xlane.xlu0 %1995 }
 0x63e   : > { %v1998_v37 = vmul.f32 0.03125, %v1996_v36 }
 0x640   : > { %v1999_v38 = vsub.f32 %v1991_v35, %v1998_v37 }
 0x642   : > { %v2000_v24 = vmul.f32 %v1999_v38, %v1999_v38 }
 0x644   : > { %v2001_v39 = vsel %vm1973_vm3, %v2000_v24, 0.0 }
 0x645   : > { %2002 = vadd.xlane.f32.xlu1 %v2001_v39 }
 0x6d2   : > { %v2003_v48 = vpop.xlane.xlu1 %2002 }
 0x6d3   : > { %v2004_v49 = vmul.f32 0.03125, %v2003_v48 }
 0x6d5   : > { %v2005_v50 = vadd.f32 1e-05, %v2004_v49 }
 0x6d7   : > { %2867 = vrsqrt.f32 %v2005_v50 }
 0x6e1   : > { %v2868_v51 = vpop.eup %2867 }
 0x6e2   : > { %v2007_v53 = vmul.f32 %v2868_v51, %v1999_v38 }
 0x6e4   : > { %v2014_v55 = vmul.f32 %v2478_v52, %v2007_v53 }
 0x6e6   : > { %v2021_v56 = vadd.f32 %v2479_v54, %v2014_v55 }
 0x6e8   : > { %v2022_v57 = vpack.c.bf16 %v2021_v56, %v2021_v56 }
 0x6ea   : > { %2711 = vmatmul.mubr.msk.bf16.vlgmr.msra.gmra.mrb[52].mxu0 %vm1973_vm3, %v2022_v57 }
 0x7bd   : > { %v2083_v61 = vpop.f32.mrb[52].mxu0 }
 0x7be   : > { %v2084_v62 = vadd.f32 %v2480_v60, %v2083_v61  ;;  %v2712_v63 = vpop.f32.mrb[53].mxu0 }
 0x7bf   : > { %v2086_v1 = vpop.f32.mrb[54].mxu0 }
 0x7c0   : > { %v2089_v2 = vmax.f32 %v2084_v62, 0.0  ;;  %v2713_v3 = vpop.f32.mrb[55].mxu0 }
 0x7c2   : > { %v2090_v4 = vpack.c.bf16 %v2089_v2, %v2089_v2 }
 0x7c4   : > { %2731 = vmatmul.mubr.bf16.vlgmr.msra.gmra.mrb[44].mxu1 %v2090_v4 }
 0x897   : > { %v2196_v5 = vpop.f32.mrb[44].mxu1 }
 0x898   : > { %v2197_v6 = vadd.f32 %v2484_v0, %v2196_v5  ;;  %v2732_v7 = vpop.f32.mrb[45].mxu1 }
 0x899   : > { %v2199_v8 = vpop.f32.mrb[46].mxu1 }
 0x89a   : > { %v2733_v9 = vpop.f32.mrb[47].mxu1  ;;  %v2202_v10 = vadd.f32 %v2197_v6, %v2021_v56 }
 0x89c   : > { %v2205_v11 = vsel %vm1973_vm3, %v2202_v10, 0.0 }
 0x89d   : > { %2206 = vadd.xlane.f32.xlu0 %v2205_v11 }
 0x92a   : > { %v2207_v12 = vpop.xlane.xlu0 %2206 }
 0x92b   : > { %v2208_v13 = vmul.f32 0.03125, %v2207_v12 }
 0x92d   : > { %v2209_v14 = vsub.f32 %v2202_v10, %v2208_v13 }
 0x92f   : > { %v2210_v15 = vmul.f32 %v2209_v14, %v2209_v14 }
 0x931   : > { %v2211_v16 = vsel %vm1973_vm3, %v2210_v15, 0.0 }
 0x932   : > { %2212 = vadd.xlane.f32.xlu1 %v2211_v16 }
 0x9bf   : > { %v2213_v17 = vpop.xlane.xlu1 %2212 }
 0x9c0   : > { %v2214_v18 = vmul.f32 0.03125, %v2213_v17 }
 0x9c2   : > { %v2215_v19 = vadd.f32 1e-05, %v2214_v18 }
 0x9c4   : > { %2869 = vrsqrt.f32 %v2215_v19 }
 0x9ce   : > { %v2870_v20 = vpop.eup %2869 }
 0x9cf   : > { %v2217_v22 = vmul.f32 %v2870_v20, %v2209_v14 }
 0x9d1   : > { %v2224_v25 = vmul.f32 %v2493_v21, %v2217_v22 }
 0x9d3   : > { %v2231_v26 = vadd.f32 %v2494_v23, %v2224_v25 }
 0x9d5   : > { %2232 = vst.msk [vmem:[%s761_s19] sm:$0xff] %vm1973_vm3, %v2231_v26 }
 0x9d6   : > { %3058 = shalt.err (!%p3055_p12)
}
 0x9d7   : > { %s3059_s6 = scalar_lea.hbm %s3805_s11, 128  ;;  %s3063_s17 = scalar_lea.hbm %s3960_s14, 256 }
 0x9d8   : > { %p3060_p7 = scmp.ne.s32.totalorder %s3805_s11, %s3059_s6  ;;  %p3064_p2 = scmp.lt.u32.totalorder %s3805_s11, %s3960_s14 }
 0x9d9   : > { %p3065_p4 = scmp.lt.u32.totalorder %s3063_s17, %s3059_s6  ;;  %p3067_p13 = scmp.lt.u32.totalorder %s3059_s6, %s3805_s11 }
 0x9da   : > { %p3061_p3 = pnand %p3060_p7, %p3961_p11 }
 0x9db   : > { %p3066_p10 = por %p3065_p4, %p3064_p2 }
 0x9dc   : > { %p3062_p9 = pneg %p3061_p3 }
 0x9dd   : > { %p3068_p1 = por %p3067_p13, %p3066_p10 }
 0x9df   : > { %p3069_p6 = pnand %p3068_p1, %p3062_p9 }
 0x9e1   : > { %3072 = shalt.err (!%p3069_p6)
}
 0x9e2   : > { %2752 = dma.vmem_to_hbm [thread:$0]  (%p3961_p11), %s3807_s1, 128, %s3805_s11, %s2234_s13  }
 0x9e3 PF: > { %s3962_s2 = sld [smem:[#allocation19_spill]]  ;;  %s3963_s24 = sld [smem:[#allocation22_spill]] }
 0x9e4   : > { %s3964_s18 = sld [smem:[#allocation21_spill]] }
 0x9e9   : > { %s2260_s27 = sand.u32 1, %s3962_s2   ;;  %p3965_p8 = scmp.ne.s32.totalorder %s3963_s24, 0 }
 0x9ea   : > { %p3966_p0 = scmp.ge.s32.totalorder %s3964_s18, 2  ;;  %s2261_s19 = scalar_lea.sflag [#allocation4], %s2260_s27 }
 0x9ec   : > { %p2775_p5 = pnand %p3966_p0, %p3965_p8 }
 0x9ee   : > { %3114 = dma.done.wait (!%p2775_p5), %s2261_s19, 128  }
 0x9ef   : > { %3116 = vsyncadd (!%p2775_p5), %s2261_s19, 4294967168  ;;  %s39_s19 = sadd.s32 1, %s3964_s18   ;;  %s3967_s10 = sld [smem:[#allocation20_spill]] }
 0x9f0   : > { %p36_p12 = scmp.ge.s32.totalorder %s39_s19, 4   ;;  %s3968_s29 = sld [smem:[#allocation25_spill]] }
 0x9f1   : > { %s3969_s26 = sld [smem:[#allocation23_spill]]  ;;  %s3970_s27 = smov %s3123_s28 }
 0x9f2   : > { %s3972_s30 = smov %s3135_s0  ;;  %38 = sbr.rel (!%p36_p12) target bundleno = 26 (0x1a), region = 179 }
 0x9f5   : > { %s3971_s28 = smov %s3967_s10 }
 0x9f7   : > { %s3973_s0 = smov %s3969_s26 }
 0x9f9   :  { %2266 = vsyncpa [#allocation3], 1 }
 0x9fa   :  { %2268 = vsyncpa [#allocation3 + $0x1], 1 }
 0x9fb   :  { %2269 = vsyncpa [#allocation6], 1 }
 0x9fc   :  { %2271 = vsyncpa [#allocation6 + $0x1], 1 }
 0x9fd   :  { %2272 = vsyncpa [#allocation9], 1 }
 0x9fe   :  { %2273 = vsyncpa [#allocation12], 1 }
 0x9ff   :  { %2274 = vsyncpa [#allocation4], 1 }
 0xa00   :  { %2276 = vsyncpa [#allocation4 + $0x1], 1 }

</bundles_post_ra>
